<compile_context>
chip_gen: v7x
topology: tpu7x:2x2x1
jax: 0.10.0
libtpu: 0.0.40
codegen_flags: <defaults>
</compile_context>

<pallas_src>
import jax
import jax.numpy as jnp
from jax.experimental import pallas as pl
from jax.experimental.pallas import tpu as pltpu


# ---------------------------------------------------------------------------
# Model dimensions (small, consistent with the module's forward)
# ---------------------------------------------------------------------------
B = 4          # real batch
BP = 8         # padded batch (fills all 8 f32 sublanes; tile-aligned slices)
T = 8          # sequence length
F = 8          # input_size (features per timestep)
H = 32         # hidden_size
A = 4          # num_assets


def trading_kernel(x_ref,                      # (T*BP, F)  bf16, time-major
                   wih0_ref, b0_ref,           # (F, 4H) bf16, (1, 4H) f32
                   whh0_ref,                   # (H, 4H) bf16
                   wih1_ref, whh1_ref, b1_ref, # (H, 4H) bf16 x2, (1, 4H) f32
                   wp1_ref, bp1_ref,           # (H, H) bf16, (1, H) f32
                   wp2_ref, bp2_ref,           # (H, A) bf16, (1, A) f32
                   out_ref):                   # (BP, A) f32
    # ----- hoisted layer-0 input projection for ALL timesteps at once -----
    # (T*BP, F) @ (F, 4H) -> (T*BP, 4H) f32; merged bias added once.
    xproj = (jnp.dot(x_ref[...], wih0_ref[...],
                     preferred_element_type=jnp.float32)
             + b0_ref[...])

    whh0 = whh0_ref[...]
    wih1 = wih1_ref[...]
    whh1 = whh1_ref[...]
    b1 = jnp.broadcast_to(b1_ref[...], (BP, 4 * H))   # hoisted broadcast

    h0 = jnp.zeros((BP, H), jnp.float32)
    c0 = jnp.zeros((BP, H), jnp.float32)
    h1 = jnp.zeros((BP, H), jnp.float32)
    c1 = jnp.zeros((BP, H), jnp.float32)

    def cell_act(gates, c_prev):
        # One full-vreg sigmoid over the whole (BP, 4H) gate tile (wasted
        # sigmoid on the g slice is free in the EUP slot), then tanh on g.
        sg = jax.nn.sigmoid(gates)
        i = sg[:, 0 * H:1 * H]
        f = sg[:, 1 * H:2 * H]
        o = sg[:, 3 * H:4 * H]
        g = jnp.tanh(gates[:, 2 * H:3 * H])
        c_new = f * c_prev + i * g
        h_new = o * jnp.tanh(c_new)
        return h_new, c_new

    # ----- fully unrolled recurrence (T is small & static) -----
    for t in range(T):
        # layer 0: input projection already done; only the recurrent matmul
        # sits on the serial critical path.  Slice is (8, 128) tile-aligned.
        g0 = (xproj[t * BP:(t + 1) * BP, :]
              + jnp.dot(h0.astype(jnp.bfloat16), whh0,
                        preferred_element_type=jnp.float32))
        h0, c0 = cell_act(g0, c0)

        # layer 1: two separate dots (no lane concat).  The h1-prev product
        # only depends on last step's h1 and can overlap layer-0's cell.
        g1 = (jnp.dot(h0.astype(jnp.bfloat16), wih1,
                      preferred_element_type=jnp.float32)
              + jnp.dot(h1.astype(jnp.bfloat16), whh1,
                        preferred_element_type=jnp.float32)
              + b1)
        h1, c1 = cell_act(g1, c1)

    # ----- position head: Linear -> ReLU -> Linear -> Tanh -----
    z = jnp.maximum(
        jnp.dot(h1.astype(jnp.bfloat16), wp1_ref[...],
                preferred_element_type=jnp.float32)
        + bp1_ref[...], 0.0)
    positions = jnp.tanh(
        jnp.dot(z.astype(jnp.bfloat16), wp2_ref[...],
                preferred_element_type=jnp.float32)
        + bp2_ref[...])                                              # (BP, A)

    # ----- scale so that sum(|pos|) <= 1 per batch row -----
    abs_sum = jnp.sum(jnp.abs(positions), axis=1, keepdims=True)     # (BP, 1)
    scale = jnp.maximum(abs_sum, 1.0)
    out_ref[...] = positions / scale


def trading_model(x, params):
    """x: (B, T, F) float32.  params: dict of pre-transposed / cast weights."""
    # Pad batch to 8 sublanes, go time-major, flatten: row index = t*BP + b.
    x_pad = jnp.zeros((BP, T, F), jnp.float32).at[:B].set(x)
    x2d = jnp.transpose(x_pad, (1, 0, 2)).reshape(T * BP, F).astype(jnp.bfloat16)

    ins = (x2d,
           params["wih0_bf"], params["b0"],
           params["whh0_bf"],
           params["wih1_bf"], params["whh1_bf"], params["b1"],
           params["wp1_bf"], params["bp1"], params["wp2_bf"], params["bp2"])

    in_specs = [pl.BlockSpec(memory_space=pltpu.MemorySpace.VMEM) for _ in ins]

    out = pl.pallas_call(
        trading_kernel,
        out_shape=jax.ShapeDtypeStruct((BP, A), jnp.float32),
        in_specs=in_specs,
        out_specs=pl.BlockSpec(memory_space=pltpu.MemorySpace.VMEM),
    )(*ins)
    return out[:B]


# ---------------------------------------------------------------------------
# Deterministic parameter init (PyTorch-style uniform(-1/sqrt(H), 1/sqrt(H)))
# ---------------------------------------------------------------------------
def init_params(key):
    bound = 1.0 / jnp.sqrt(jnp.float32(H))
    keys = jax.random.split(key, 12)

    def u(k, shape):
        return jax.random.uniform(k, shape, jnp.float32, -bound, bound)

    # PyTorch layouts: W_ih_l0 (4H, F), W_hh_l0 (4H, H), biases (4H,)
    w_ih_l0 = u(keys[0], (4 * H, F))
    w_hh_l0 = u(keys[1], (4 * H, H))
    b_ih_l0 = u(keys[2], (4 * H,))
    b_hh_l0 = u(keys[3], (4 * H,))
    w_ih_l1 = u(keys[4], (4 * H, H))
    w_hh_l1 = u(keys[5], (4 * H, H))
    b_ih_l1 = u(keys[6], (4 * H,))
    b_hh_l1 = u(keys[7], (4 * H,))
    # head: Linear(H, H), Linear(H, A)
    w1 = u(keys[8], (H, H))
    bb1 = u(keys[9], (H,))
    w2 = u(keys[10], (A, H))
    bb2 = u(keys[11], (A,))

    # Kernel-layout weights: pre-transposed; matmul operands in bf16,
    # biases (added to f32 accumulators) stay f32.  Keep f32 copies for the
    # pure-JAX reference.
    p = {
        "wih0": w_ih_l0.T,                                   # (F, 4H) f32
        "whh0": w_hh_l0.T,                                   # (H, 4H) f32
        "wih1": w_ih_l1.T,                                   # (H, 4H) f32
        "whh1": w_hh_l1.T,                                   # (H, 4H) f32
        "b0": (b_ih_l0 + b_hh_l0).reshape(1, 4 * H),
        "b1": (b_ih_l1 + b_hh_l1).reshape(1, 4 * H),
        "wp1": w1.T,                                         # (H, H) f32
        "bp1": bb1.reshape(1, H),
        "wp2": w2.T,                                         # (H, A) f32
        "bp2": bb2.reshape(1, A),
    }
    p["wih0_bf"] = p["wih0"].astype(jnp.bfloat16)
    p["whh0_bf"] = p["whh0"].astype(jnp.bfloat16)
    p["wih1_bf"] = p["wih1"].astype(jnp.bfloat16)
    p["whh1_bf"] = p["whh1"].astype(jnp.bfloat16)
    p["wp1_bf"] = p["wp1"].astype(jnp.bfloat16)
    p["wp2_bf"] = p["wp2"].astype(jnp.bfloat16)
    return p


# ---------------------------------------------------------------------------
# Pure-JAX f32 reference (mirrors torch semantics) for a correctness check
# ---------------------------------------------------------------------------
def reference(x, p):
    def cell(x_t, h, c, wx, wh, b):
        g = x_t @ wx + h @ wh + b
        i = jax.nn.sigmoid(g[:, 0 * H:1 * H])
        f = jax.nn.sigmoid(g[:, 1 * H:2 * H])
        gg = jnp.tanh(g[:, 2 * H:3 * H])
        o = jax.nn.sigmoid(g[:, 3 * H:4 * H])
        c = f * c + i * gg
        h = o * jnp.tanh(c)
        return h, c

    h0 = c0 = h1 = c1 = jnp.zeros((B, H), jnp.float32)
    for t in range(T):
        h0, c0 = cell(x[:, t, :], h0, c0, p["wih0"], p["whh0"], p["b0"])
        h1, c1 = cell(h0, h1, c1, p["wih1"], p["whh1"], p["b1"])
    z = jnp.maximum(h1 @ p["wp1"] + p["bp1"], 0.0)
    pos = jnp.tanh(z @ p["wp2"] + p["bp2"])
    scale = jnp.maximum(jnp.sum(jnp.abs(pos), axis=1, keepdims=True), 1.0)
    return pos / scale


if __name__ == "__main__":
    key = jax.random.PRNGKey(0)
    k_x, k_p = jax.random.split(key)
    x = jax.random.normal(k_x, (B, T, F), jnp.float32)
    params = init_params(k_p)

    out = trading_model(x, params)
    out = jax.block_until_ready(out)

    ref = reference(x, params)
    assert out.shape == (B, A)
    # bf16 MXU inputs (f32 accumulation): tolerance relaxed per review.
    assert jnp.allclose(out, ref, atol=2e-2, rtol=2e-2), (out, ref)
    print("KERNEL_OK")
</pallas_src>

<mosaic_0001>
module attributes {stable_mosaic.version = 11 : i64} {
  func.func @trading_kernel(%arg0: memref<64x8xbf16, #tpu.memory_space<vmem>>, %arg1: memref<8x128xbf16, #tpu.memory_space<vmem>>, %arg2: memref<1x128xf32, #tpu.memory_space<vmem>>, %arg3: memref<32x128xbf16, #tpu.memory_space<vmem>>, %arg4: memref<32x128xbf16, #tpu.memory_space<vmem>>, %arg5: memref<32x128xbf16, #tpu.memory_space<vmem>>, %arg6: memref<1x128xf32, #tpu.memory_space<vmem>>, %arg7: memref<32x32xbf16, #tpu.memory_space<vmem>>, %arg8: memref<1x32xf32, #tpu.memory_space<vmem>>, %arg9: memref<32x4xbf16, #tpu.memory_space<vmem>>, %arg10: memref<1x4xf32, #tpu.memory_space<vmem>>, %arg11: memref<8x4xf32, #tpu.memory_space<vmem>>) attributes {dimension_semantics = [], scalar_prefetch = 0 : i64, scratch_operands = 0 : i64, tpu.core_type = #tpu.core_type<tc>} {
    %c0 = arith.constant 0 : index
    %c0_0 = arith.constant 0 : index
    %0 = vector.load %arg0[%c0, %c0_0] : memref<64x8xbf16, #tpu.memory_space<vmem>>, vector<64x8xbf16>
    %c0_1 = arith.constant 0 : index
    %c0_2 = arith.constant 0 : index
    %1 = vector.load %arg1[%c0_1, %c0_2] : memref<8x128xbf16, #tpu.memory_space<vmem>>, vector<8x128xbf16>
    %cst = arith.constant dense<0.000000e+00> : vector<64x128xf32>
    %2 = tpu.matmul %0, %1, %cst {dimension_numbers = #tpu.dot_dimension_numbers<[1], [0], [0], [1], [0, 0, 1, 1], [], []>} : vector<64x8xbf16>, vector<8x128xbf16>, vector<64x128xf32> -> vector<64x128xf32>
    %c0_3 = arith.constant 0 : index
    %c0_4 = arith.constant 0 : index
    %3 = vector.load %arg2[%c0_3, %c0_4] : memref<1x128xf32, #tpu.memory_space<vmem>>, vector<1x128xf32>
    %4 = vector.broadcast %3 : vector<1x128xf32> to vector<64x128xf32>
    %5 = arith.addf %2, %4 : vector<64x128xf32>
    %c0_5 = arith.constant 0 : index
    %c0_6 = arith.constant 0 : index
    %6 = vector.load %arg3[%c0_5, %c0_6] : memref<32x128xbf16, #tpu.memory_space<vmem>>, vector<32x128xbf16>
    %c0_7 = arith.constant 0 : index
    %c0_8 = arith.constant 0 : index
    %7 = vector.load %arg4[%c0_7, %c0_8] : memref<32x128xbf16, #tpu.memory_space<vmem>>, vector<32x128xbf16>
    %c0_9 = arith.constant 0 : index
    %c0_10 = arith.constant 0 : index
    %8 = vector.load %arg5[%c0_9, %c0_10] : memref<32x128xbf16, #tpu.memory_space<vmem>>, vector<32x128xbf16>
    %c0_11 = arith.constant 0 : index
    %c0_12 = arith.constant 0 : index
    %9 = vector.load %arg6[%c0_11, %c0_12] : memref<1x128xf32, #tpu.memory_space<vmem>>, vector<1x128xf32>
    %10 = vector.shape_cast %9 : vector<1x128xf32> to vector<1x128xf32>
    %11 = vector.broadcast %10 : vector<1x128xf32> to vector<8x128xf32>
    %cst_13 = arith.constant 0.000000e+00 : f32
    %12 = vector.broadcast %cst_13 : f32 to vector<8x32xf32>
    %cst_14 = arith.constant 0.000000e+00 : f32
    %13 = vector.broadcast %cst_14 : f32 to vector<8x32xf32>
    %cst_15 = arith.constant 0.000000e+00 : f32
    %14 = vector.broadcast %cst_15 : f32 to vector<8x32xf32>
    %cst_16 = arith.constant 0.000000e+00 : f32
    %15 = vector.broadcast %cst_16 : f32 to vector<8x32xf32>
    %16 = vector.extract_strided_slice %5 {offsets = [0, 0], sizes = [8, 128], strides = [1, 1]} : vector<64x128xf32> to vector<8x128xf32>
    %17 = arith.truncf %12 : vector<8x32xf32> to vector<8x32xbf16>
    %cst_17 = arith.constant dense<0.000000e+00> : vector<8x128xf32>
    %18 = tpu.matmul %17, %6, %cst_17 {dimension_numbers = #tpu.dot_dimension_numbers<[1], [0], [0], [1], [0, 0, 1, 1], [], []>} : vector<8x32xbf16>, vector<32x128xbf16>, vector<8x128xf32> -> vector<8x128xf32>
    %19 = arith.addf %16, %18 : vector<8x128xf32>
    %20 = arith.negf %19 : vector<8x128xf32>
    %21 = math.exp %20 : vector<8x128xf32>
    %cst_18 = arith.constant 1.000000e+00 : f32
    %22 = vector.broadcast %cst_18 : f32 to vector<8x128xf32>
    %23 = arith.addf %22, %21 : vector<8x128xf32>
    %24 = arith.divf %22, %23 : vector<8x128xf32>
    %25 = vector.extract_strided_slice %24 {offsets = [0, 0], sizes = [8, 32], strides = [1, 1]} : vector<8x128xf32> to vector<8x32xf32>
    %26 = vector.extract_strided_slice %24 {offsets = [0, 32], sizes = [8, 32], strides = [1, 1]} : vector<8x128xf32> to vector<8x32xf32>
    %27 = vector.extract_strided_slice %24 {offsets = [0, 96], sizes = [8, 32], strides = [1, 1]} : vector<8x128xf32> to vector<8x32xf32>
    %28 = vector.extract_strided_slice %19 {offsets = [0, 64], sizes = [8, 32], strides = [1, 1]} : vector<8x128xf32> to vector<8x32xf32>
    %29 = math.tanh %28 : vector<8x32xf32>
    %30 = arith.mulf %26, %13 : vector<8x32xf32>
    %31 = arith.mulf %25, %29 : vector<8x32xf32>
    %32 = arith.addf %30, %31 : vector<8x32xf32>
    %33 = math.tanh %32 : vector<8x32xf32>
    %34 = arith.mulf %27, %33 : vector<8x32xf32>
    %35 = arith.truncf %34 : vector<8x32xf32> to vector<8x32xbf16>
    %cst_19 = arith.constant dense<0.000000e+00> : vector<8x128xf32>
    %36 = tpu.matmul %35, %7, %cst_19 {dimension_numbers = #tpu.dot_dimension_numbers<[1], [0], [0], [1], [0, 0, 1, 1], [], []>} : vector<8x32xbf16>, vector<32x128xbf16>, vector<8x128xf32> -> vector<8x128xf32>
    %37 = arith.truncf %14 : vector<8x32xf32> to vector<8x32xbf16>
    %cst_20 = arith.constant dense<0.000000e+00> : vector<8x128xf32>
    %38 = tpu.matmul %37, %8, %cst_20 {dimension_numbers = #tpu.dot_dimension_numbers<[1], [0], [0], [1], [0, 0, 1, 1], [], []>} : vector<8x32xbf16>, vector<32x128xbf16>, vector<8x128xf32> -> vector<8x128xf32>
    %39 = arith.addf %36, %38 : vector<8x128xf32>
    %40 = arith.addf %39, %11 : vector<8x128xf32>
    %41 = arith.negf %40 : vector<8x128xf32>
    %42 = math.exp %41 : vector<8x128xf32>
    %cst_21 = arith.constant 1.000000e+00 : f32
    %43 = vector.broadcast %cst_21 : f32 to vector<8x128xf32>
    %44 = arith.addf %43, %42 : vector<8x128xf32>
    %45 = arith.divf %43, %44 : vector<8x128xf32>
    %46 = vector.extract_strided_slice %45 {offsets = [0, 0], sizes = [8, 32], strides = [1, 1]} : vector<8x128xf32> to vector<8x32xf32>
    %47 = vector.extract_strided_slice %45 {offsets = [0, 32], sizes = [8, 32], strides = [1, 1]} : vector<8x128xf32> to vector<8x32xf32>
    %48 = vector.extract_strided_slice %45 {offsets = [0, 96], sizes = [8, 32], strides = [1, 1]} : vector<8x128xf32> to vector<8x32xf32>
    %49 = vector.extract_strided_slice %40 {offsets = [0, 64], sizes = [8, 32], strides = [1, 1]} : vector<8x128xf32> to vector<8x32xf32>
    %50 = math.tanh %49 : vector<8x32xf32>
    %51 = arith.mulf %47, %15 : vector<8x32xf32>
    %52 = arith.mulf %46, %50 : vector<8x32xf32>
    %53 = arith.addf %51, %52 : vector<8x32xf32>
    %54 = math.tanh %53 : vector<8x32xf32>
    %55 = arith.mulf %48, %54 : vector<8x32xf32>
    %56 = vector.extract_strided_slice %5 {offsets = [8, 0], sizes = [8, 128], strides = [1, 1]} : vector<64x128xf32> to vector<8x128xf32>
    %57 = arith.truncf %34 : vector<8x32xf32> to vector<8x32xbf16>
    %cst_22 = arith.constant dense<0.000000e+00> : vector<8x128xf32>
    %58 = tpu.matmul %57, %6, %cst_22 {dimension_numbers = #tpu.dot_dimension_numbers<[1], [0], [0], [1], [0, 0, 1, 1], [], []>} : vector<8x32xbf16>, vector<32x128xbf16>, vector<8x128xf32> -> vector<8x128xf32>
    %59 = arith.addf %56, %58 : vector<8x128xf32>
    %60 = arith.negf %59 : vector<8x128xf32>
    %61 = math.exp %60 : vector<8x128xf32>
    %cst_23 = arith.constant 1.000000e+00 : f32
    %62 = vector.broadcast %cst_23 : f32 to vector<8x128xf32>
    %63 = arith.addf %62, %61 : vector<8x128xf32>
    %64 = arith.divf %62, %63 : vector<8x128xf32>
    %65 = vector.extract_strided_slice %64 {offsets = [0, 0], sizes = [8, 32], strides = [1, 1]} : vector<8x128xf32> to vector<8x32xf32>
    %66 = vector.extract_strided_slice %64 {offsets = [0, 32], sizes = [8, 32], strides = [1, 1]} : vector<8x128xf32> to vector<8x32xf32>
    %67 = vector.extract_strided_slice %64 {offsets = [0, 96], sizes = [8, 32], strides = [1, 1]} : vector<8x128xf32> to vector<8x32xf32>
    %68 = vector.extract_strided_slice %59 {offsets = [0, 64], sizes = [8, 32], strides = [1, 1]} : vector<8x128xf32> to vector<8x32xf32>
    %69 = math.tanh %68 : vector<8x32xf32>
    %70 = arith.mulf %66, %32 : vector<8x32xf32>
    %71 = arith.mulf %65, %69 : vector<8x32xf32>
    %72 = arith.addf %70, %71 : vector<8x32xf32>
    %73 = math.tanh %72 : vector<8x32xf32>
    %74 = arith.mulf %67, %73 : vector<8x32xf32>
    %75 = arith.truncf %74 : vector<8x32xf32> to vector<8x32xbf16>
    %cst_24 = arith.constant dense<0.000000e+00> : vector<8x128xf32>
    %76 = tpu.matmul %75, %7, %cst_24 {dimension_numbers = #tpu.dot_dimension_numbers<[1], [0], [0], [1], [0, 0, 1, 1], [], []>} : vector<8x32xbf16>, vector<32x128xbf16>, vector<8x128xf32> -> vector<8x128xf32>
    %77 = arith.truncf %55 : vector<8x32xf32> to vector<8x32xbf16>
    %cst_25 = arith.constant dense<0.000000e+00> : vector<8x128xf32>
    %78 = tpu.matmul %77, %8, %cst_25 {dimension_numbers = #tpu.dot_dimension_numbers<[1], [0], [0], [1], [0, 0, 1, 1], [], []>} : vector<8x32xbf16>, vector<32x128xbf16>, vector<8x128xf32> -> vector<8x128xf32>
    %79 = arith.addf %76, %78 : vector<8x128xf32>
    %80 = arith.addf %79, %11 : vector<8x128xf32>
    %81 = arith.negf %80 : vector<8x128xf32>
    %82 = math.exp %81 : vector<8x128xf32>
    %cst_26 = arith.constant 1.000000e+00 : f32
    %83 = vector.broadcast %cst_26 : f32 to vector<8x128xf32>
    %84 = arith.addf %83, %82 : vector<8x128xf32>
    %85 = arith.divf %83, %84 : vector<8x128xf32>
    %86 = vector.extract_strided_slice %85 {offsets = [0, 0], sizes = [8, 32], strides = [1, 1]} : vector<8x128xf32> to vector<8x32xf32>
    %87 = vector.extract_strided_slice %85 {offsets = [0, 32], sizes = [8, 32], strides = [1, 1]} : vector<8x128xf32> to vector<8x32xf32>
    %88 = vector.extract_strided_slice %85 {offsets = [0, 96], sizes = [8, 32], strides = [1, 1]} : vector<8x128xf32> to vector<8x32xf32>
    %89 = vector.extract_strided_slice %80 {offsets = [0, 64], sizes = [8, 32], strides = [1, 1]} : vector<8x128xf32> to vector<8x32xf32>
    %90 = math.tanh %89 : vector<8x32xf32>
    %91 = arith.mulf %87, %53 : vector<8x32xf32>
    %92 = arith.mulf %86, %90 : vector<8x32xf32>
    %93 = arith.addf %91, %92 : vector<8x32xf32>
    %94 = math.tanh %93 : vector<8x32xf32>
    %95 = arith.mulf %88, %94 : vector<8x32xf32>
    %96 = vector.extract_strided_slice %5 {offsets = [16, 0], sizes = [8, 128], strides = [1, 1]} : vector<64x128xf32> to vector<8x128xf32>
    %97 = arith.truncf %74 : vector<8x32xf32> to vector<8x32xbf16>
    %cst_27 = arith.constant dense<0.000000e+00> : vector<8x128xf32>
    %98 = tpu.matmul %97, %6, %cst_27 {dimension_numbers = #tpu.dot_dimension_numbers<[1], [0], [0], [1], [0, 0, 1, 1], [], []>} : vector<8x32xbf16>, vector<32x128xbf16>, vector<8x128xf32> -> vector<8x128xf32>
    %99 = arith.addf %96, %98 : vector<8x128xf32>
    %100 = arith.negf %99 : vector<8x128xf32>
    %101 = math.exp %100 : vector<8x128xf32>
    %cst_28 = arith.constant 1.000000e+00 : f32
    %102 = vector.broadcast %cst_28 : f32 to vector<8x128xf32>
    %103 = arith.addf %102, %101 : vector<8x128xf32>
    %104 = arith.divf %102, %103 : vector<8x128xf32>
    %105 = vector.extract_strided_slice %104 {offsets = [0, 0], sizes = [8, 32], strides = [1, 1]} : vector<8x128xf32> to vector<8x32xf32>
    %106 = vector.extract_strided_slice %104 {offsets = [0, 32], sizes = [8, 32], strides = [1, 1]} : vector<8x128xf32> to vector<8x32xf32>
    %107 = vector.extract_strided_slice %104 {offsets = [0, 96], sizes = [8, 32], strides = [1, 1]} : vector<8x128xf32> to vector<8x32xf32>
    %108 = vector.extract_strided_slice %99 {offsets = [0, 64], sizes = [8, 32], strides = [1, 1]} : vector<8x128xf32> to vector<8x32xf32>
    %109 = math.tanh %108 : vector<8x32xf32>
    %110 = arith.mulf %106, %72 : vector<8x32xf32>
    %111 = arith.mulf %105, %109 : vector<8x32xf32>
    %112 = arith.addf %110, %111 : vector<8x32xf32>
    %113 = math.tanh %112 : vector<8x32xf32>
    %114 = arith.mulf %107, %113 : vector<8x32xf32>
    %115 = arith.truncf %114 : vector<8x32xf32> to vector<8x32xbf16>
    %cst_29 = arith.constant dense<0.000000e+00> : vector<8x128xf32>
    %116 = tpu.matmul %115, %7, %cst_29 {dimension_numbers = #tpu.dot_dimension_numbers<[1], [0], [0], [1], [0, 0, 1, 1], [], []>} : vector<8x32xbf16>, vector<32x128xbf16>, vector<8x128xf32> -> vector<8x128xf32>
    %117 = arith.truncf %95 : vector<8x32xf32> to vector<8x32xbf16>
    %cst_30 = arith.constant dense<0.000000e+00> : vector<8x128xf32>
    %118 = tpu.matmul %117, %8, %cst_30 {dimension_numbers = #tpu.dot_dimension_numbers<[1], [0], [0], [1], [0, 0, 1, 1], [], []>} : vector<8x32xbf16>, vector<32x128xbf16>, vector<8x128xf32> -> vector<8x128xf32>
    %119 = arith.addf %116, %118 : vector<8x128xf32>
    %120 = arith.addf %119, %11 : vector<8x128xf32>
    %121 = arith.negf %120 : vector<8x128xf32>
    %122 = math.exp %121 : vector<8x128xf32>
    %cst_31 = arith.constant 1.000000e+00 : f32
    %123 = vector.broadcast %cst_31 : f32 to vector<8x128xf32>
    %124 = arith.addf %123, %122 : vector<8x128xf32>
    %125 = arith.divf %123, %124 : vector<8x128xf32>
    %126 = vector.extract_strided_slice %125 {offsets = [0, 0], sizes = [8, 32], strides = [1, 1]} : vector<8x128xf32> to vector<8x32xf32>
    %127 = vector.extract_strided_slice %125 {offsets = [0, 32], sizes = [8, 32], strides = [1, 1]} : vector<8x128xf32> to vector<8x32xf32>
    %128 = vector.extract_strided_slice %125 {offsets = [0, 96], sizes = [8, 32], strides = [1, 1]} : vector<8x128xf32> to vector<8x32xf32>
    %129 = vector.extract_strided_slice %120 {offsets = [0, 64], sizes = [8, 32], strides = [1, 1]} : vector<8x128xf32> to vector<8x32xf32>
    %130 = math.tanh %129 : vector<8x32xf32>
    %131 = arith.mulf %127, %93 : vector<8x32xf32>
    %132 = arith.mulf %126, %130 : vector<8x32xf32>
    %133 = arith.addf %131, %132 : vector<8x32xf32>
    %134 = math.tanh %133 : vector<8x32xf32>
    %135 = arith.mulf %128, %134 : vector<8x32xf32>
    %136 = vector.extract_strided_slice %5 {offsets = [24, 0], sizes = [8, 128], strides = [1, 1]} : vector<64x128xf32> to vector<8x128xf32>
    %137 = arith.truncf %114 : vector<8x32xf32> to vector<8x32xbf16>
    %cst_32 = arith.constant dense<0.000000e+00> : vector<8x128xf32>
    %138 = tpu.matmul %137, %6, %cst_32 {dimension_numbers = #tpu.dot_dimension_numbers<[1], [0], [0], [1], [0, 0, 1, 1], [], []>} : vector<8x32xbf16>, vector<32x128xbf16>, vector<8x128xf32> -> vector<8x128xf32>
    %139 = arith.addf %136, %138 : vector<8x128xf32>
    %140 = arith.negf %139 : vector<8x128xf32>
    %141 = math.exp %140 : vector<8x128xf32>
    %cst_33 = arith.constant 1.000000e+00 : f32
    %142 = vector.broadcast %cst_33 : f32 to vector<8x128xf32>
    %143 = arith.addf %142, %141 : vector<8x128xf32>
    %144 = arith.divf %142, %143 : vector<8x128xf32>
    %145 = vector.extract_strided_slice %144 {offsets = [0, 0], sizes = [8, 32], strides = [1, 1]} : vector<8x128xf32> to vector<8x32xf32>
    %146 = vector.extract_strided_slice %144 {offsets = [0, 32], sizes = [8, 32], strides = [1, 1]} : vector<8x128xf32> to vector<8x32xf32>
    %147 = vector.extract_strided_slice %144 {offsets = [0, 96], sizes = [8, 32], strides = [1, 1]} : vector<8x128xf32> to vector<8x32xf32>
    %148 = vector.extract_strided_slice %139 {offsets = [0, 64], sizes = [8, 32], strides = [1, 1]} : vector<8x128xf32> to vector<8x32xf32>
    %149 = math.tanh %148 : vector<8x32xf32>
    %150 = arith.mulf %146, %112 : vector<8x32xf32>
    %151 = arith.mulf %145, %149 : vector<8x32xf32>
    %152 = arith.addf %150, %151 : vector<8x32xf32>
    %153 = math.tanh %152 : vector<8x32xf32>
    %154 = arith.mulf %147, %153 : vector<8x32xf32>
    %155 = arith.truncf %154 : vector<8x32xf32> to vector<8x32xbf16>
    %cst_34 = arith.constant dense<0.000000e+00> : vector<8x128xf32>
    %156 = tpu.matmul %155, %7, %cst_34 {dimension_numbers = #tpu.dot_dimension_numbers<[1], [0], [0], [1], [0, 0, 1, 1], [], []>} : vector<8x32xbf16>, vector<32x128xbf16>, vector<8x128xf32> -> vector<8x128xf32>
    %157 = arith.truncf %135 : vector<8x32xf32> to vector<8x32xbf16>
    %cst_35 = arith.constant dense<0.000000e+00> : vector<8x128xf32>
    %158 = tpu.matmul %157, %8, %cst_35 {dimension_numbers = #tpu.dot_dimension_numbers<[1], [0], [0], [1], [0, 0, 1, 1], [], []>} : vector<8x32xbf16>, vector<32x128xbf16>, vector<8x128xf32> -> vector<8x128xf32>
    %159 = arith.addf %156, %158 : vector<8x128xf32>
    %160 = arith.addf %159, %11 : vector<8x128xf32>
    %161 = arith.negf %160 : vector<8x128xf32>
    %162 = math.exp %161 : vector<8x128xf32>
    %cst_36 = arith.constant 1.000000e+00 : f32
    %163 = vector.broadcast %cst_36 : f32 to vector<8x128xf32>
    %164 = arith.addf %163, %162 : vector<8x128xf32>
    %165 = arith.divf %163, %164 : vector<8x128xf32>
    %166 = vector.extract_strided_slice %165 {offsets = [0, 0], sizes = [8, 32], strides = [1, 1]} : vector<8x128xf32> to vector<8x32xf32>
    %167 = vector.extract_strided_slice %165 {offsets = [0, 32], sizes = [8, 32], strides = [1, 1]} : vector<8x128xf32> to vector<8x32xf32>
    %168 = vector.extract_strided_slice %165 {offsets = [0, 96], sizes = [8, 32], strides = [1, 1]} : vector<8x128xf32> to vector<8x32xf32>
    %169 = vector.extract_strided_slice %160 {offsets = [0, 64], sizes = [8, 32], strides = [1, 1]} : vector<8x128xf32> to vector<8x32xf32>
    %170 = math.tanh %169 : vector<8x32xf32>
    %171 = arith.mulf %167, %133 : vector<8x32xf32>
    %172 = arith.mulf %166, %170 : vector<8x32xf32>
    %173 = arith.addf %171, %172 : vector<8x32xf32>
    %174 = math.tanh %173 : vector<8x32xf32>
    %175 = arith.mulf %168, %174 : vector<8x32xf32>
    %176 = vector.extract_strided_slice %5 {offsets = [32, 0], sizes = [8, 128], strides = [1, 1]} : vector<64x128xf32> to vector<8x128xf32>
    %177 = arith.truncf %154 : vector<8x32xf32> to vector<8x32xbf16>
    %cst_37 = arith.constant dense<0.000000e+00> : vector<8x128xf32>
    %178 = tpu.matmul %177, %6, %cst_37 {dimension_numbers = #tpu.dot_dimension_numbers<[1], [0], [0], [1], [0, 0, 1, 1], [], []>} : vector<8x32xbf16>, vector<32x128xbf16>, vector<8x128xf32> -> vector<8x128xf32>
    %179 = arith.addf %176, %178 : vector<8x128xf32>
    %180 = arith.negf %179 : vector<8x128xf32>
    %181 = math.exp %180 : vector<8x128xf32>
    %cst_38 = arith.constant 1.000000e+00 : f32
    %182 = vector.broadcast %cst_38 : f32 to vector<8x128xf32>
    %183 = arith.addf %182, %181 : vector<8x128xf32>
    %184 = arith.divf %182, %183 : vector<8x128xf32>
    %185 = vector.extract_strided_slice %184 {offsets = [0, 0], sizes = [8, 32], strides = [1, 1]} : vector<8x128xf32> to vector<8x32xf32>
    %186 = vector.extract_strided_slice %184 {offsets = [0, 32], sizes = [8, 32], strides = [1, 1]} : vector<8x128xf32> to vector<8x32xf32>
    %187 = vector.extract_strided_slice %184 {offsets = [0, 96], sizes = [8, 32], strides = [1, 1]} : vector<8x128xf32> to vector<8x32xf32>
    %188 = vector.extract_strided_slice %179 {offsets = [0, 64], sizes = [8, 32], strides = [1, 1]} : vector<8x128xf32> to vector<8x32xf32>
    %189 = math.tanh %188 : vector<8x32xf32>
    %190 = arith.mulf %186, %152 : vector<8x32xf32>
    %191 = arith.mulf %185, %189 : vector<8x32xf32>
    %192 = arith.addf %190, %191 : vector<8x32xf32>
    %193 = math.tanh %192 : vector<8x32xf32>
    %194 = arith.mulf %187, %193 : vector<8x32xf32>
    %195 = arith.truncf %194 : vector<8x32xf32> to vector<8x32xbf16>
    %cst_39 = arith.constant dense<0.000000e+00> : vector<8x128xf32>
    %196 = tpu.matmul %195, %7, %cst_39 {dimension_numbers = #tpu.dot_dimension_numbers<[1], [0], [0], [1], [0, 0, 1, 1], [], []>} : vector<8x32xbf16>, vector<32x128xbf16>, vector<8x128xf32> -> vector<8x128xf32>
    %197 = arith.truncf %175 : vector<8x32xf32> to vector<8x32xbf16>
    %cst_40 = arith.constant dense<0.000000e+00> : vector<8x128xf32>
    %198 = tpu.matmul %197, %8, %cst_40 {dimension_numbers = #tpu.dot_dimension_numbers<[1], [0], [0], [1], [0, 0, 1, 1], [], []>} : vector<8x32xbf16>, vector<32x128xbf16>, vector<8x128xf32> -> vector<8x128xf32>
    %199 = arith.addf %196, %198 : vector<8x128xf32>
    %200 = arith.addf %199, %11 : vector<8x128xf32>
    %201 = arith.negf %200 : vector<8x128xf32>
    %202 = math.exp %201 : vector<8x128xf32>
    %cst_41 = arith.constant 1.000000e+00 : f32
    %203 = vector.broadcast %cst_41 : f32 to vector<8x128xf32>
    %204 = arith.addf %203, %202 : vector<8x128xf32>
    %205 = arith.divf %203, %204 : vector<8x128xf32>
    %206 = vector.extract_strided_slice %205 {offsets = [0, 0], sizes = [8, 32], strides = [1, 1]} : vector<8x128xf32> to vector<8x32xf32>
    %207 = vector.extract_strided_slice %205 {offsets = [0, 32], sizes = [8, 32], strides = [1, 1]} : vector<8x128xf32> to vector<8x32xf32>
    %208 = vector.extract_strided_slice %205 {offsets = [0, 96], sizes = [8, 32], strides = [1, 1]} : vector<8x128xf32> to vector<8x32xf32>
    %209 = vector.extract_strided_slice %200 {offsets = [0, 64], sizes = [8, 32], strides = [1, 1]} : vector<8x128xf32> to vector<8x32xf32>
    %210 = math.tanh %209 : vector<8x32xf32>
    %211 = arith.mulf %207, %173 : vector<8x32xf32>
    %212 = arith.mulf %206, %210 : vector<8x32xf32>
    %213 = arith.addf %211, %212 : vector<8x32xf32>
    %214 = math.tanh %213 : vector<8x32xf32>
    %215 = arith.mulf %208, %214 : vector<8x32xf32>
    %216 = vector.extract_strided_slice %5 {offsets = [40, 0], sizes = [8, 128], strides = [1, 1]} : vector<64x128xf32> to vector<8x128xf32>
    %217 = arith.truncf %194 : vector<8x32xf32> to vector<8x32xbf16>
    %cst_42 = arith.constant dense<0.000000e+00> : vector<8x128xf32>
    %218 = tpu.matmul %217, %6, %cst_42 {dimension_numbers = #tpu.dot_dimension_numbers<[1], [0], [0], [1], [0, 0, 1, 1], [], []>} : vector<8x32xbf16>, vector<32x128xbf16>, vector<8x128xf32> -> vector<8x128xf32>
    %219 = arith.addf %216, %218 : vector<8x128xf32>
    %220 = arith.negf %219 : vector<8x128xf32>
    %221 = math.exp %220 : vector<8x128xf32>
    %cst_43 = arith.constant 1.000000e+00 : f32
    %222 = vector.broadcast %cst_43 : f32 to vector<8x128xf32>
    %223 = arith.addf %222, %221 : vector<8x128xf32>
    %224 = arith.divf %222, %223 : vector<8x128xf32>
    %225 = vector.extract_strided_slice %224 {offsets = [0, 0], sizes = [8, 32], strides = [1, 1]} : vector<8x128xf32> to vector<8x32xf32>
    %226 = vector.extract_strided_slice %224 {offsets = [0, 32], sizes = [8, 32], strides = [1, 1]} : vector<8x128xf32> to vector<8x32xf32>
    %227 = vector.extract_strided_slice %224 {offsets = [0, 96], sizes = [8, 32], strides = [1, 1]} : vector<8x128xf32> to vector<8x32xf32>
    %228 = vector.extract_strided_slice %219 {offsets = [0, 64], sizes = [8, 32], strides = [1, 1]} : vector<8x128xf32> to vector<8x32xf32>
    %229 = math.tanh %228 : vector<8x32xf32>
    %230 = arith.mulf %226, %192 : vector<8x32xf32>
    %231 = arith.mulf %225, %229 : vector<8x32xf32>
    %232 = arith.addf %230, %231 : vector<8x32xf32>
    %233 = math.tanh %232 : vector<8x32xf32>
    %234 = arith.mulf %227, %233 : vector<8x32xf32>
    %235 = arith.truncf %234 : vector<8x32xf32> to vector<8x32xbf16>
    %cst_44 = arith.constant dense<0.000000e+00> : vector<8x128xf32>
    %236 = tpu.matmul %235, %7, %cst_44 {dimension_numbers = #tpu.dot_dimension_numbers<[1], [0], [0], [1], [0, 0, 1, 1], [], []>} : vector<8x32xbf16>, vector<32x128xbf16>, vector<8x128xf32> -> vector<8x128xf32>
    %237 = arith.truncf %215 : vector<8x32xf32> to vector<8x32xbf16>
    %cst_45 = arith.constant dense<0.000000e+00> : vector<8x128xf32>
    %238 = tpu.matmul %237, %8, %cst_45 {dimension_numbers = #tpu.dot_dimension_numbers<[1], [0], [0], [1], [0, 0, 1, 1], [], []>} : vector<8x32xbf16>, vector<32x128xbf16>, vector<8x128xf32> -> vector<8x128xf32>
    %239 = arith.addf %236, %238 : vector<8x128xf32>
    %240 = arith.addf %239, %11 : vector<8x128xf32>
    %241 = arith.negf %240 : vector<8x128xf32>
    %242 = math.exp %241 : vector<8x128xf32>
    %cst_46 = arith.constant 1.000000e+00 : f32
    %243 = vector.broadcast %cst_46 : f32 to vector<8x128xf32>
    %244 = arith.addf %243, %242 : vector<8x128xf32>
    %245 = arith.divf %243, %244 : vector<8x128xf32>
    %246 = vector.extract_strided_slice %245 {offsets = [0, 0], sizes = [8, 32], strides = [1, 1]} : vector<8x128xf32> to vector<8x32xf32>
    %247 = vector.extract_strided_slice %245 {offsets = [0, 32], sizes = [8, 32], strides = [1, 1]} : vector<8x128xf32> to vector<8x32xf32>
    %248 = vector.extract_strided_slice %245 {offsets = [0, 96], sizes = [8, 32], strides = [1, 1]} : vector<8x128xf32> to vector<8x32xf32>
    %249 = vector.extract_strided_slice %240 {offsets = [0, 64], sizes = [8, 32], strides = [1, 1]} : vector<8x128xf32> to vector<8x32xf32>
    %250 = math.tanh %249 : vector<8x32xf32>
    %251 = arith.mulf %247, %213 : vector<8x32xf32>
    %252 = arith.mulf %246, %250 : vector<8x32xf32>
    %253 = arith.addf %251, %252 : vector<8x32xf32>
    %254 = math.tanh %253 : vector<8x32xf32>
    %255 = arith.mulf %248, %254 : vector<8x32xf32>
    %256 = vector.extract_strided_slice %5 {offsets = [48, 0], sizes = [8, 128], strides = [1, 1]} : vector<64x128xf32> to vector<8x128xf32>
    %257 = arith.truncf %234 : vector<8x32xf32> to vector<8x32xbf16>
    %cst_47 = arith.constant dense<0.000000e+00> : vector<8x128xf32>
    %258 = tpu.matmul %257, %6, %cst_47 {dimension_numbers = #tpu.dot_dimension_numbers<[1], [0], [0], [1], [0, 0, 1, 1], [], []>} : vector<8x32xbf16>, vector<32x128xbf16>, vector<8x128xf32> -> vector<8x128xf32>
    %259 = arith.addf %256, %258 : vector<8x128xf32>
    %260 = arith.negf %259 : vector<8x128xf32>
    %261 = math.exp %260 : vector<8x128xf32>
    %cst_48 = arith.constant 1.000000e+00 : f32
    %262 = vector.broadcast %cst_48 : f32 to vector<8x128xf32>
    %263 = arith.addf %262, %261 : vector<8x128xf32>
    %264 = arith.divf %262, %263 : vector<8x128xf32>
    %265 = vector.extract_strided_slice %264 {offsets = [0, 0], sizes = [8, 32], strides = [1, 1]} : vector<8x128xf32> to vector<8x32xf32>
    %266 = vector.extract_strided_slice %264 {offsets = [0, 32], sizes = [8, 32], strides = [1, 1]} : vector<8x128xf32> to vector<8x32xf32>
    %267 = vector.extract_strided_slice %264 {offsets = [0, 96], sizes = [8, 32], strides = [1, 1]} : vector<8x128xf32> to vector<8x32xf32>
    %268 = vector.extract_strided_slice %259 {offsets = [0, 64], sizes = [8, 32], strides = [1, 1]} : vector<8x128xf32> to vector<8x32xf32>
    %269 = math.tanh %268 : vector<8x32xf32>
    %270 = arith.mulf %266, %232 : vector<8x32xf32>
    %271 = arith.mulf %265, %269 : vector<8x32xf32>
    %272 = arith.addf %270, %271 : vector<8x32xf32>
    %273 = math.tanh %272 : vector<8x32xf32>
    %274 = arith.mulf %267, %273 : vector<8x32xf32>
    %275 = arith.truncf %274 : vector<8x32xf32> to vector<8x32xbf16>
    %cst_49 = arith.constant dense<0.000000e+00> : vector<8x128xf32>
    %276 = tpu.matmul %275, %7, %cst_49 {dimension_numbers = #tpu.dot_dimension_numbers<[1], [0], [0], [1], [0, 0, 1, 1], [], []>} : vector<8x32xbf16>, vector<32x128xbf16>, vector<8x128xf32> -> vector<8x128xf32>
    %277 = arith.truncf %255 : vector<8x32xf32> to vector<8x32xbf16>
    %cst_50 = arith.constant dense<0.000000e+00> : vector<8x128xf32>
    %278 = tpu.matmul %277, %8, %cst_50 {dimension_numbers = #tpu.dot_dimension_numbers<[1], [0], [0], [1], [0, 0, 1, 1], [], []>} : vector<8x32xbf16>, vector<32x128xbf16>, vector<8x128xf32> -> vector<8x128xf32>
    %279 = arith.addf %276, %278 : vector<8x128xf32>
    %280 = arith.addf %279, %11 : vector<8x128xf32>
    %281 = arith.negf %280 : vector<8x128xf32>
    %282 = math.exp %281 : vector<8x128xf32>
    %cst_51 = arith.constant 1.000000e+00 : f32
    %283 = vector.broadcast %cst_51 : f32 to vector<8x128xf32>
    %284 = arith.addf %283, %282 : vector<8x128xf32>
    %285 = arith.divf %283, %284 : vector<8x128xf32>
    %286 = vector.extract_strided_slice %285 {offsets = [0, 0], sizes = [8, 32], strides = [1, 1]} : vector<8x128xf32> to vector<8x32xf32>
    %287 = vector.extract_strided_slice %285 {offsets = [0, 32], sizes = [8, 32], strides = [1, 1]} : vector<8x128xf32> to vector<8x32xf32>
    %288 = vector.extract_strided_slice %285 {offsets = [0, 96], sizes = [8, 32], strides = [1, 1]} : vector<8x128xf32> to vector<8x32xf32>
    %289 = vector.extract_strided_slice %280 {offsets = [0, 64], sizes = [8, 32], strides = [1, 1]} : vector<8x128xf32> to vector<8x32xf32>
    %290 = math.tanh %289 : vector<8x32xf32>
    %291 = arith.mulf %287, %253 : vector<8x32xf32>
    %292 = arith.mulf %286, %290 : vector<8x32xf32>
    %293 = arith.addf %291, %292 : vector<8x32xf32>
    %294 = math.tanh %293 : vector<8x32xf32>
    %295 = arith.mulf %288, %294 : vector<8x32xf32>
    %296 = vector.extract_strided_slice %5 {offsets = [56, 0], sizes = [8, 128], strides = [1, 1]} : vector<64x128xf32> to vector<8x128xf32>
    %297 = arith.truncf %274 : vector<8x32xf32> to vector<8x32xbf16>
    %cst_52 = arith.constant dense<0.000000e+00> : vector<8x128xf32>
    %298 = tpu.matmul %297, %6, %cst_52 {dimension_numbers = #tpu.dot_dimension_numbers<[1], [0], [0], [1], [0, 0, 1, 1], [], []>} : vector<8x32xbf16>, vector<32x128xbf16>, vector<8x128xf32> -> vector<8x128xf32>
    %299 = arith.addf %296, %298 : vector<8x128xf32>
    %300 = arith.negf %299 : vector<8x128xf32>
    %301 = math.exp %300 : vector<8x128xf32>
    %cst_53 = arith.constant 1.000000e+00 : f32
    %302 = vector.broadcast %cst_53 : f32 to vector<8x128xf32>
    %303 = arith.addf %302, %301 : vector<8x128xf32>
    %304 = arith.divf %302, %303 : vector<8x128xf32>
    %305 = vector.extract_strided_slice %304 {offsets = [0, 0], sizes = [8, 32], strides = [1, 1]} : vector<8x128xf32> to vector<8x32xf32>
    %306 = vector.extract_strided_slice %304 {offsets = [0, 32], sizes = [8, 32], strides = [1, 1]} : vector<8x128xf32> to vector<8x32xf32>
    %307 = vector.extract_strided_slice %304 {offsets = [0, 96], sizes = [8, 32], strides = [1, 1]} : vector<8x128xf32> to vector<8x32xf32>
    %308 = vector.extract_strided_slice %299 {offsets = [0, 64], sizes = [8, 32], strides = [1, 1]} : vector<8x128xf32> to vector<8x32xf32>
    %309 = math.tanh %308 : vector<8x32xf32>
    %310 = arith.mulf %306, %272 : vector<8x32xf32>
    %311 = arith.mulf %305, %309 : vector<8x32xf32>
    %312 = arith.addf %310, %311 : vector<8x32xf32>
    %313 = math.tanh %312 : vector<8x32xf32>
    %314 = arith.mulf %307, %313 : vector<8x32xf32>
    %315 = arith.truncf %314 : vector<8x32xf32> to vector<8x32xbf16>
    %cst_54 = arith.constant dense<0.000000e+00> : vector<8x128xf32>
    %316 = tpu.matmul %315, %7, %cst_54 {dimension_numbers = #tpu.dot_dimension_numbers<[1], [0], [0], [1], [0, 0, 1, 1], [], []>} : vector<8x32xbf16>, vector<32x128xbf16>, vector<8x128xf32> -> vector<8x128xf32>
    %317 = arith.truncf %295 : vector<8x32xf32> to vector<8x32xbf16>
    %cst_55 = arith.constant dense<0.000000e+00> : vector<8x128xf32>
    %318 = tpu.matmul %317, %8, %cst_55 {dimension_numbers = #tpu.dot_dimension_numbers<[1], [0], [0], [1], [0, 0, 1, 1], [], []>} : vector<8x32xbf16>, vector<32x128xbf16>, vector<8x128xf32> -> vector<8x128xf32>
    %319 = arith.addf %316, %318 : vector<8x128xf32>
    %320 = arith.addf %319, %11 : vector<8x128xf32>
    %321 = arith.negf %320 : vector<8x128xf32>
    %322 = math.exp %321 : vector<8x128xf32>
    %cst_56 = arith.constant 1.000000e+00 : f32
    %323 = vector.broadcast %cst_56 : f32 to vector<8x128xf32>
    %324 = arith.addf %323, %322 : vector<8x128xf32>
    %325 = arith.divf %323, %324 : vector<8x128xf32>
    %326 = vector.extract_strided_slice %325 {offsets = [0, 0], sizes = [8, 32], strides = [1, 1]} : vector<8x128xf32> to vector<8x32xf32>
    %327 = vector.extract_strided_slice %325 {offsets = [0, 32], sizes = [8, 32], strides = [1, 1]} : vector<8x128xf32> to vector<8x32xf32>
    %328 = vector.extract_strided_slice %325 {offsets = [0, 96], sizes = [8, 32], strides = [1, 1]} : vector<8x128xf32> to vector<8x32xf32>
    %329 = vector.extract_strided_slice %320 {offsets = [0, 64], sizes = [8, 32], strides = [1, 1]} : vector<8x128xf32> to vector<8x32xf32>
    %330 = math.tanh %329 : vector<8x32xf32>
    %331 = arith.mulf %327, %293 : vector<8x32xf32>
    %332 = arith.mulf %326, %330 : vector<8x32xf32>
    %333 = arith.addf %331, %332 : vector<8x32xf32>
    %334 = math.tanh %333 : vector<8x32xf32>
    %335 = arith.mulf %328, %334 : vector<8x32xf32>
    %336 = arith.truncf %335 : vector<8x32xf32> to vector<8x32xbf16>
    %c0_57 = arith.constant 0 : index
    %c0_58 = arith.constant 0 : index
    %337 = vector.load %arg7[%c0_57, %c0_58] : memref<32x32xbf16, #tpu.memory_space<vmem>>, vector<32x32xbf16>
    %cst_59 = arith.constant dense<0.000000e+00> : vector<8x32xf32>
    %338 = tpu.matmul %336, %337, %cst_59 {dimension_numbers = #tpu.dot_dimension_numbers<[1], [0], [0], [1], [0, 0, 1, 1], [], []>} : vector<8x32xbf16>, vector<32x32xbf16>, vector<8x32xf32> -> vector<8x32xf32>
    %c0_60 = arith.constant 0 : index
    %c0_61 = arith.constant 0 : index
    %339 = vector.load %arg8[%c0_60, %c0_61] : memref<1x32xf32, #tpu.memory_space<vmem>>, vector<1x32xf32>
    %340 = vector.broadcast %339 : vector<1x32xf32> to vector<8x32xf32>
    %341 = arith.addf %338, %340 : vector<8x32xf32>
    %cst_62 = arith.constant 0.000000e+00 : f32
    %342 = vector.broadcast %cst_62 : f32 to vector<8x32xf32>
    %343 = arith.maximumf %341, %342 : vector<8x32xf32>
    %344 = arith.truncf %343 : vector<8x32xf32> to vector<8x32xbf16>
    %c0_63 = arith.constant 0 : index
    %c0_64 = arith.constant 0 : index
    %345 = vector.load %arg9[%c0_63, %c0_64] : memref<32x4xbf16, #tpu.memory_space<vmem>>, vector<32x4xbf16>
    %cst_65 = arith.constant dense<0.000000e+00> : vector<8x4xf32>
    %346 = tpu.matmul %344, %345, %cst_65 {dimension_numbers = #tpu.dot_dimension_numbers<[1], [0], [0], [1], [0, 0, 1, 1], [], []>} : vector<8x32xbf16>, vector<32x4xbf16>, vector<8x4xf32> -> vector<8x4xf32>
    %c0_66 = arith.constant 0 : index
    %c0_67 = arith.constant 0 : index
    %347 = vector.load %arg10[%c0_66, %c0_67] : memref<1x4xf32, #tpu.memory_space<vmem>>, vector<1x4xf32>
    %348 = vector.broadcast %347 : vector<1x4xf32> to vector<8x4xf32>
    %349 = arith.addf %346, %348 : vector<8x4xf32>
    %350 = math.tanh %349 : vector<8x4xf32>
    %351 = math.absf %350 : vector<8x4xf32>
    %cst_68 = arith.constant dense<0.000000e+00> : vector<8xf32>
    %352 = vector.multi_reduction <add>, %351, %cst_68 [1] : vector<8x4xf32> to vector<8xf32>
    %353 = vector.shape_cast %352 : vector<8xf32> to vector<8x1xf32>
    %cst_69 = arith.constant 1.000000e+00 : f32
    %354 = vector.broadcast %cst_69 : f32 to vector<8x1xf32>
    %355 = arith.maximumf %353, %354 : vector<8x1xf32>
    %356 = vector.broadcast %355 : vector<8x1xf32> to vector<8x4xf32>
    %357 = arith.divf %350, %356 : vector<8x4xf32>
    %c0_70 = arith.constant 0 : index
    %c0_71 = arith.constant 0 : index
    %358 = vector.load %arg11[%c0_70, %c0_71] : memref<8x4xf32, #tpu.memory_space<vmem>>, vector<8x4xf32>
    tpu.vector_store %arg11[%c0_70, %c0_71], %357 {strides = array<i32>} : memref<8x4xf32, #tpu.memory_space<vmem>>, vector<8x4xf32>,
    return
  }
}

</mosaic_0001>

<bundles_post_ra>
// kernel: tpu_custom_call.1
= control target key start
LH: loop header
LB: loop body
LE: loop exit
PB: predicated region body
PF: predicated region fallthrough
CT: control target
= control target key end

     0   :  { %16 = vsyncpa [#allocation3], 0  ;;  %s2394_s17 = smov [#allocation2]   ;;  %s2894_s0 = inlined_call_operand.vmem [shape: bf16[64,8], index: 0, kind: input, shape index: {}]   ;;  %s2895_s1 = inlined_call_operand.hbm [shape: bf16[8,128], index: 1, kind: input, shape index: {}]   ;;  %s2896_s2 = inlined_call_operand.vmem [shape: f32[1,128], index: 2, kind: input, shape index: {}]   ;;  %s2897_s3 = inlined_call_operand.vmem [shape: bf16[32,128], index: 3, kind: input, shape index: {}]   ;;  %s2898_s4 = inlined_call_operand.vmem [shape: bf16[32,128], index: 4, kind: input, shape index: {}]   ;;  %s2899_s5 = inlined_call_operand.vmem [shape: bf16[32,128], index: 5, kind: input, shape index: {}]   ;;  %s2900_s6 = inlined_call_operand.vmem [shape: f32[1,128], index: 6, kind: input, shape index: {}]   ;;  %s2901_s7 = inlined_call_operand.vmem [shape: bf16[32,32], index: 7, kind: input, shape index: {}]   ;;  %s2902_s8 = inlined_call_operand.vmem [shape: f32[1,32], index: 8, kind: input, shape index: {}]   ;;  %s2903_s9 = inlined_call_operand.vmem [shape: bf16[32,4], index: 9, kind: input, shape index: {}]   ;;  %s2904_s10 = inlined_call_operand.vmem [shape: f32[1,4], index: 10, kind: input, shape index: {}]   ;;  %s2905_s11 = inlined_call_operand.vmem [shape: f32[8,4], index: 11, kind: output, shape index: {}]  }
   0x1   :  { %s25_s18 = sshll.u32 %s2394_s17, 4  ;;  %s2370_s21 = scalar_lea.hbm %s2895_s1, 64  ;;  %s26_s18 = int_to_ptr.vmem [resolvable:$true] %s25_s18 }
   0x2   :  { %p2371_p0 = scmp.ne.s32.totalorder %s2895_s1, %s2370_s21  ;;  %p2374_p1 = scmp.lt.u32.totalorder %s2370_s21, %s2895_s1 }
   0x4   :  { %p2376_p2 = pnand %p2374_p1, %p2371_p0 }
   0x6   :  { %2379 = shalt.err (!%p2376_p2)
}
   0x7   :  { %s2380_s26 = scalar_lea.vmem %s26_s18, 64  ;;  %p2385_p4 = scmp.lt.s32.totalorder %s26_s18, %s26_s18 }
   0x8   :  { %p2381_p3 = scmp.ne.s32.totalorder %s26_s18, %s2380_s26  ;;  %p2386_p5 = scmp.lt.s32.totalorder %s2380_s26, %s2380_s26 }
   0xa   :  { %p2387_p6 = por %p2386_p5, %p2385_p4 }
   0xc   :  { %p2388_p7 = pnand %p2387_p6, %p2381_p3 }
   0xe   :  { %2391 = shalt.err (!%p2388_p7)
}
   0xf   :  { %28 = dma.hbm_to_vmem [thread:$0]  %s2895_s1, 64, %s26_s18, [#allocation3]  }
  0x10   :  { %2392 = dma.done.wait [#allocation3], 64  }
  0x11   :  { %2393 = vsyncadd [#allocation3], 4294967232  ;;  %v2395_v0 = vmov 0.0   ;;  %vm2396_vm0 = vmmov 0   ;;  %vm100_vm1 = vcmask 1043456   ;;  %vm87_vm2 = vcmask 64512  }
  0x12   :  { %2001 = vmatprep.subr.bf16.mxu1 %v2395_v0  ;;  %2005 = vmatprep.mubr.msk.bf16.mxu1 %vm2396_vm0, %v2395_v0  ;;  %v59_v1 = vld [vmem:[#allocation2] sm:$0xf]  ;;  %v2218_v5 = vld [vmem:[%s2894_s0 + $0x8] sm:$0xff]   ;;  %v2397_v7 = vmov 0   ;;  %s2398_s19 = smov 64   ;;  %s2399_s20 = smov 32  }
  0x13   :  { %2209 = vmatprep.subr.msk.bf16.mxu0 %vm100_vm1, %v59_v1  ;;  %v102_v2 = vsel %vm100_vm1, %v59_v1, 0  ;;  %v2478_v3 = vld [vmem:[%s2897_s3] sm:$0xff]   ;;  %v2493_v6 = vld [vmem:[%s2897_s3 + $0x8] sm:$0xff]   ;;  %v2222_v31 = vld [vmem:[%s2894_s0 + $0x10] sm:$0xff]   ;;  %vm200_vm3 = vcmask 261120   ;;  %vm1833_vm4 = vcmask 31744  }
  0x14   :  { %1992 = vmatpush3.bf16.msra.mxu0 %v102_v2  ;;  %v2217_v4 = vld [vmem:[%s2894_s0] sm:$0xff]   ;;  %2002 = vmatpush3.bf16.msra.mxu1 %v2478_v3  ;;  %v2224_v32 = vld [vmem:[%s2894_s0 + $0x18] sm:$0xff]   ;;  %v2538_v33 = vld [vmem:[%s2899_s5 + $0x8] sm:$0xff]  }
  0x15   :  { %2017 = vmatprep.subr.bf16.mxu0 %v2395_v0  ;;  %1993 = vmatprep.mubr.msk.bf16.mxu0 %vm87_vm2, %v2217_v4  ;;  %v2503_v8 = vld [vmem:[%s2896_s2] ss:$0 sm:$0xff]  ;;  %v2543_v34 = vld [vmem:[%s2898_s4 + $0x8] sm:$0xff]  }
  0x16   :  { %2003 = vmatprep.subr.bf16.mxu1 %v2395_v0  ;;  %v2520_v29 = vld [vmem:[%s2899_s5] sm:$0xff]  }
  0x17   :  { %1994 = vmatmul.mubr.msk.bf16.vlgmr.msra.gmra.mrb[0].mxu0 %vm87_vm2, %v2218_v5  ;;  %v2525_v30 = vld [vmem:[%s2898_s4] sm:$0xff]  }
  0x18   :  { %2004 = vmatpush3.bf16.msra.mxu1 %v2493_v6  ;;  %2018 = vmatpush3.bf16.msra.mxu0 %v2525_v30  ;;  %v2590_v49 = vld [vmem:[%s2900_s6] ss:$0 sm:$0xff] }
  0x19   :  { %2009 = vmatprep.subr.bf16.mxu1 %v2395_v0  ;;  %1997 = vmatprep.mubr.msk.bf16.mxu0 %vm87_vm2, %v2222_v31 }
  0x1a   :  { %2019 = vmatprep.subr.bf16.mxu0 %v2395_v0 }
  0x1b   :  { %2006 = vmatmul.mubr.bf16.vlgmr.msra.gmra.mrb[0].mxu1 %v2397_v7 }
  0x1c   :  { %2013 = vmatprep.mubr.msk.bf16.mxu1 %vm2396_vm0, %v2395_v0  ;;  %2010 = vmatpush3.bf16.msra.mxu1 %v2520_v29 }
  0x1d   :  { %2011 = vmatprep.subr.bf16.mxu1 %v2395_v0  ;;  %2020 = vmatpush3.bf16.msra.mxu0 %v2543_v34 }
  0x1e   :  { %2033 = vmatprep.subr.bf16.mxu0 %v2395_v0 }
  0x1f   :  { %1998 = vmatmul.mubr.msk.bf16.gmra.mrb[4].mxu0 %vm87_vm2, %v2224_v32 }
  0x20   :  { %2021 = vmatprep.mubr.msk.bf16.mxu0 %vm2396_vm0, %v2395_v0  ;;  %2012 = vmatpush3.bf16.msra.mxu1 %v2538_v33 }
  0x21   :  { %2025 = vmatprep.subr.bf16.mxu1 %v2395_v0 }
  0x23   :  { %2014 = vmatmul.mubr.bf16.vlgmr.msra.gmra.mrb[4].mxu1 %v2397_v7 }
  0x24   :  { %2026 = vmatpush3.bf16.msra.mxu1 %v2478_v3  ;;  %2029 = vmatprep.mubr.msk.bf16.mxu1 %vm2396_vm0, %v2395_v0 }
  0x25   :  { %2027 = vmatprep.subr.bf16.mxu1 %v2395_v0 }
  0x28   :  { %2028 = vmatpush3.bf16.msra.mxu1 %v2493_v6 }
  0x29   :  { %2041 = vmatprep.subr.bf16.mxu1 %v2395_v0 }
  0xea   :  { %v2505_v9 = vpop.f32.mrb[0].mxu0 }
  0xeb   :  { %v138_v10 = vpop.f32.mrb[1].mxu0 }
  0xec   :  { %v139_v11 = vadd.f32 %v2503_v8, %v138_v10  ;;  %v2508_v12 = vpop.f32.mrb[2].mxu0 }
  0xed   :  { %v2510_v13 = vpop.f32.mrb[3].mxu0 }
  0xee   :  { %v238_v14 = vpop.f32.mrb[0].mxu1  ;;  %v142_v48 = vadd.f32 %v2503_v8, %v2510_v13 }
  0xef   :  { %v244_v15 = vadd.f32 %v238_v14, %v139_v11  ;;  %v2007_v16 = vpop.f32.mrb[1].mxu1 }
  0xf0   :  { %v241_v17 = vpop.f32.mrb[2].mxu1 }
  0xf1   :  { %2230 = vtanh.f32 %v244_v15  ;;  %v2008_v18 = vpop.f32.mrb[3].mxu1  ;;  %v1858_v20 = vmul.f32 -1.442695, %v244_v15 }
  0xf2   :  { %v2563_v39 = vpop.f32.mrb[4].mxu0 }
  0xf3   :  { %2232 = vpow2.f32 %v1858_v20  ;;  %v2565_v40 = vpop.f32.mrb[5].mxu0 }
  0xf4   :  { %v2567_v41 = vpop.f32.mrb[6].mxu0 }
  0xf5   :  { %v2569_v42 = vpop.f32.mrb[7].mxu0 }
  0xf6   :  { %v316_v43 = vpop.f32.mrb[4].mxu1 }
  0xf7   :  { %v2015_v44 = vpop.f32.mrb[5].mxu1 }
  0xf8   :  { %v319_v45 = vpop.f32.mrb[6].mxu1 }
  0xf9   :  { %v2016_v46 = vpop.f32.mrb[7].mxu1 }
  0xfb   :  { %v2231_v19 = vpop.eup %2230 }
  0xfc   :  { %254 = vrot.lane.b32.xlu0 %v2231_v19, %s2398_s19 }
  0xfd   :  { %v2233_v21 = vpop.eup %2232 }
  0xfe   :  { %v248_v22 = vadd.f32 1.0, %v2233_v21 }
 0x100   :  { %2234 = vrcp.f32 %v248_v22 }
 0x10a   :  { %v2235_v23 = vpop.eup %2234 }
 0x10b   :  { %v252_v26 = vmul.f32 0.0, %v2235_v23 }
 0x16e   :  { %v255_v24 = vpop.permute.xlu0 %254 }
 0x16f   :  { %v257_v25 = vmul.f32 %v2235_v23, %v255_v24 }
 0x171   :  { %259 = vrot.lane.b32.xlu0 %v257_v25, %s2399_s20 }
 0x1e3   :  { %v260_v27 = vpop.permute.xlu0 %259 }
 0x1e4   :  { %v2514_v28 = vadd.f32 %v260_v27, %v252_v26 }
 0x1e6   :  { %2236 = vtanh.f32 %v2514_v28 }
 0x1f0   :  { %v2237_v35 = vpop.eup %2236 }
 0x1f1   :  { %265 = vrot.lane.b32.xlu1 %v2237_v35, %s2398_s19 }
 0x263   :  { %v266_v36 = vpop.permute.xlu1 %265 }
 0x264   :  { %v268_v37 = vmul.f32 %v2235_v23, %v266_v36 }
 0x266   :  { %v269_v38 = vpack.c.bf16 %v268_v37, %v268_v37 }
 0x268   :  { %323 = vrot.lane.b32.xlu1 %v269_v38, %s2399_s20 }
 0x2da   :  { %v324_v47 = vpop.permute.xlu1 %323 }
 0x2db   :  { %2022 = vmatmul.mubr.msk.bf16.vlgmr.msra.gmra.mrb[8].mxu0 %vm200_vm3, %v324_v47  ;;  %2030 = vmatmul.mubr.msk.bf16.vlgmr.msra.gmra.mrb[8].mxu1 %vm200_vm3, %v324_v47 }
 0x2dc   :  { %2042 = vmatpush3.bf16.msra.mxu1 %v2525_v30  ;;  %2034 = vmatpush3.bf16.msra.mxu0 %v2520_v29 }
 0x2dd   :  { %2043 = vmatprep.subr.bf16.mxu1 %v2395_v0  ;;  %2035 = vmatprep.subr.bf16.mxu0 %v2395_v0 }
 0x2de   :  { %2045 = vmatprep.mubr.msk.bf16.mxu1 %vm2396_vm0, %v2395_v0  ;;  %2037 = vmatprep.mubr.msk.bf16.mxu0 %vm2396_vm0, %v2395_v0 }
 0x2e0   :  { %2044 = vmatpush3.bf16.msra.mxu1 %v2543_v34  ;;  %2036 = vmatpush3.bf16.msra.mxu0 %v2538_v33 }
 0x2e1   :  { %2049 = vmatprep.subr.bf16.mxu0 %v2395_v0  ;;  %2057 = vmatprep.subr.bf16.mxu1 %v2395_v0 }
 0x3ae   :  { %v374_v50 = vpop.f32.mrb[8].mxu0  ;;  %v439_v51 = vpop.f32.mrb[8].mxu1 }
 0x3af   :  { %v375_v52 = vadd.f32 %v374_v50, %v316_v43  ;;  %v445_v53 = vadd.f32 %v439_v51, %v142_v48  ;;  %v2023_v54 = vpop.f32.mrb[9].mxu0  ;;  %v2031_v55 = vpop.f32.mrb[9].mxu1 }
 0x3b0   :  { %v377_v56 = vpop.f32.mrb[10].mxu0  ;;  %v442_v57 = vpop.f32.mrb[10].mxu1 }
 0x3b1   :  { %v380_v58 = vadd.f32 %v2590_v49, %v375_v52  ;;  %2238 = vtanh.f32 %v445_v53  ;;  %v2024_v59 = vpop.f32.mrb[11].mxu0  ;;  %v2032_v60 = vpop.f32.mrb[11].mxu1  ;;  %v1866_v63 = vmul.f32 -1.442695, %v445_v53  ;;  %v147_v52 = vadd.f32 %v2505_v9, %v2503_v8 }
 0x3b3   :  { %2240 = vtanh.f32 %v380_v58  ;;  %v1864_v1 = vmul.f32 -1.442695, %v380_v58 }
 0x3b4   :  { %2242 = vpow2.f32 %v1866_v63 }
 0x3b5   :  { %2244 = vpow2.f32 %v1864_v1 }
 0x3bb   :  { %v2239_v61 = vpop.eup %2238 }
 0x3bc   :  { %455 = vrot.lane.b32.xlu1 %v2239_v61, %s2398_s19 }
 0x3bd   :  { %v2241_v62 = vpop.eup %2240 }
 0x3be   :  { %390 = vrot.lane.b32.xlu0 %v2241_v62, %s2398_s19  ;;  %v2243_v2 = vpop.eup %2242 }
 0x3bf   :  { %v2245_v4 = vpop.eup %2244  ;;  %v449_v5 = vadd.f32 1.0, %v2243_v2 }
 0x3c0   :  { %v384_v7 = vadd.f32 1.0, %v2245_v4 }
 0x3c1   :  { %2246 = vrcp.f32 %v449_v5 }
 0x3c2   :  { %2248 = vrcp.f32 %v384_v7 }
 0x3cb   :  { %v2247_v10 = vpop.eup %2246 }
 0x3cc   :  { %v2249_v14 = vpop.eup %2248  ;;  %v453_v17 = vmul.f32 %v2247_v10, %v2514_v28 }
 0x3cd   :  { %v388_v20 = vmul.f32 0.0, %v2249_v14 }
 0x42e   :  { %v456_v11 = vpop.permute.xlu1 %455 }
 0x42f   :  { %v458_v13 = vmul.f32 %v2247_v10, %v456_v11 }
 0x430   :  { %v391_v15 = vpop.permute.xlu0 %390 }
 0x431   :  { %v393_v16 = vmul.f32 %v2249_v14, %v391_v15  ;;  %460 = vrot.lane.b32.xlu1 %v458_v13, %s2399_s20 }
 0x433   :  { %395 = vrot.lane.b32.xlu0 %v393_v16, %s2399_s20 }
 0x4a3   :  { %v461_v18 = vpop.permute.xlu1 %460 }
 0x4a4   :  { %v2598_v19 = vadd.f32 %v461_v18, %v453_v17 }
 0x4a5   :  { %v396_v21 = vpop.permute.xlu0 %395 }
 0x4a6   :  { %2250 = vtanh.f32 %v2598_v19  ;;  %v2601_v22 = vadd.f32 %v396_v21, %v388_v20 }
 0x4a8   :  { %2252 = vtanh.f32 %v2601_v22 }
 0x4b0   :  { %v2251_v23 = vpop.eup %2250 }
 0x4b1   :  { %466 = vrot.lane.b32.xlu1 %v2251_v23, %s2398_s19 }
 0x4b2   :  { %v2253_v24 = vpop.eup %2252 }
 0x4b3   :  { %401 = vrot.lane.b32.xlu0 %v2253_v24, %s2398_s19 }
 0x523   :  { %v467_v25 = vpop.permute.xlu1 %466 }
 0x524   :  { %v469_v26 = vmul.f32 %v2247_v10, %v467_v25 }
 0x525   :  { %v402_v27 = vpop.permute.xlu0 %401 }
 0x526   :  { %v470_v28 = vpack.c.bf16 %v469_v26, %v469_v26  ;;  %v404_v31 = vmul.f32 %v2249_v14, %v402_v27 }
 0x528   :  { %v471_v32 = vpack.c.bf16 %v404_v31, %v404_v31  ;;  %519 = vrot.lane.b32.xlu1 %v470_v28, %s2399_s20 }
 0x52a   :  { %473 = vrot.lane.b32.xlu0 %v471_v32, %s2399_s20 }
 0x59a   :  { %v520_v35 = vpop.permute.xlu1 %519 }
 0x59b   :  { %2046 = vmatmul.mubr.msk.bf16.vlgmr.msra.gmra.mrb[12].mxu1 %vm200_vm3, %v520_v35 }
 0x59c   :  { %v474_v36 = vpop.permute.xlu0 %473  ;;  %2058 = vmatpush3.bf16.msra.mxu1 %v2520_v29  ;;  %2061 = vmatprep.mubr.msk.bf16.mxu1 %vm2396_vm0, %v2395_v0 }
 0x59d   :  { %2038 = vmatmul.mubr.msk.bf16.vlgmr.msra.gmra.mrb[12].mxu0 %vm200_vm3, %v474_v36  ;;  %2059 = vmatprep.subr.bf16.mxu1 %v2395_v0 }
 0x59e   :  { %2050 = vmatpush3.bf16.msra.mxu0 %v2478_v3  ;;  %2053 = vmatprep.mubr.msk.bf16.mxu0 %vm2396_vm0, %v2395_v0 }
 0x59f   :  { %2051 = vmatprep.subr.bf16.mxu0 %v2395_v0 }
 0x5a0   :  { %2060 = vmatpush3.bf16.msra.mxu1 %v2538_v33 }
 0x5a1   :  { %2073 = vmatprep.subr.bf16.mxu1 %v2395_v0 }
 0x5a2   :  { %2052 = vmatpush3.bf16.msra.mxu0 %v2493_v6 }
 0x5a3   :  { %2065 = vmatprep.subr.bf16.mxu0 %v2395_v0 }
 0x5a5   :  { %2054 = vmatmul.mubr.msk.bf16.vlgmr.msra.gmra.mrb[16].mxu0 %vm200_vm3, %v520_v35 }
 0x5a6   :  { %2066 = vmatpush3.bf16.msra.mxu0 %v2525_v30  ;;  %2069 = vmatprep.mubr.msk.bf16.mxu0 %vm2396_vm0, %v2395_v0 }
 0x5a7   :  { %2067 = vmatprep.subr.bf16.mxu0 %v2395_v0 }
 0x5aa   :  { %2068 = vmatpush3.bf16.msra.mxu0 %v2543_v34 }
 0x5ab   :  { %2081 = vmatprep.subr.bf16.mxu0 %v2395_v0 }
 0x66e   :  { %v558_v37 = vpop.f32.mrb[12].mxu1 }
 0x66f   :  { %v2047_v38 = vpop.f32.mrb[13].mxu1 }
 0x670   :  { %v512_v43 = vpop.f32.mrb[12].mxu0  ;;  %v561_v44 = vpop.f32.mrb[14].mxu1  ;;  %v150_v38 = vadd.f32 %v2508_v12, %v2503_v8 }
 0x671   :  { %v559_v45 = vadd.f32 %v558_v37, %v512_v43  ;;  %v2039_v46 = vpop.f32.mrb[13].mxu0  ;;  %v2048_v47 = vpop.f32.mrb[15].mxu1 }
 0x672   :  { %v515_v48 = vpop.f32.mrb[14].mxu0 }
 0x673   :  { %v564_v50 = vadd.f32 %v2590_v49, %v559_v45  ;;  %v2040_v51 = vpop.f32.mrb[15].mxu0 }
 0x675   :  { %2254 = vtanh.f32 %v564_v50  ;;  %v1869_v60 = vmul.f32 -1.442695, %v564_v50 }
 0x678   :  { %v623_v53 = vpop.f32.mrb[16].mxu0 }
 0x679   :  { %v629_v54 = vadd.f32 %v623_v53, %v147_v52  ;;  %v2055_v55 = vpop.f32.mrb[17].mxu0 }
 0x67a   :  { %v626_v56 = vpop.f32.mrb[18].mxu0 }
 0x67b   :  { %2256 = vtanh.f32 %v629_v54  ;;  %v2056_v57 = vpop.f32.mrb[19].mxu0  ;;  %v1871_v61 = vmul.f32 -1.442695, %v629_v54 }
 0x67c   :  { %2258 = vpow2.f32 %v1869_v60 }
 0x67d   :  { %2260 = vpow2.f32 %v1871_v61 }
 0x67f   :  { %v2255_v58 = vpop.eup %2254 }
 0x680   :  { %574 = vrot.lane.b32.xlu0 %v2255_v58, %s2398_s19 }
 0x685   :  { %v2257_v59 = vpop.eup %2256 }
 0x686   :  { %639 = vrot.lane.b32.xlu1 %v2257_v59, %s2398_s19  ;;  %v2259_v62 = vpop.eup %2258 }
 0x687   :  { %v568_v63 = vadd.f32 1.0, %v2259_v62  ;;  %v2261_v1 = vpop.eup %2260 }
 0x688   :  { %v633_v9 = vadd.f32 1.0, %v2261_v1 }
 0x689   :  { %2262 = vrcp.f32 %v568_v63 }
 0x68a   :  { %2264 = vrcp.f32 %v633_v9 }
 0x693   :  { %v2263_v2 = vpop.eup %2262 }
 0x694   :  { %v2265_v7 = vpop.eup %2264  ;;  %v572_v13 = vmul.f32 %v2263_v2, %v2601_v22 }
 0x695   :  { %v637_v16 = vmul.f32 %v2265_v7, %v2598_v19 }
 0x6f2   :  { %v575_v4 = vpop.permute.xlu0 %574 }
 0x6f3   :  { %v577_v5 = vmul.f32 %v2263_v2, %v575_v4 }
 0x6f5   :  { %579 = vrot.lane.b32.xlu0 %v577_v5, %s2399_s20 }
 0x6f8   :  { %v640_v10 = vpop.permute.xlu1 %639 }
 0x6f9   :  { %v642_v11 = vmul.f32 %v2265_v7, %v640_v10 }
 0x6fb   :  { %644 = vrot.lane.b32.xlu1 %v642_v11, %s2399_s20 }
 0x767   :  { %v580_v14 = vpop.permute.xlu0 %579 }
 0x768   :  { %v2637_v15 = vadd.f32 %v580_v14, %v572_v13 }
 0x76a   :  { %2266 = vtanh.f32 %v2637_v15 }
 0x76d   :  { %v645_v17 = vpop.permute.xlu1 %644 }
 0x76e   :  { %v2641_v18 = vadd.f32 %v645_v17, %v637_v16 }
 0x770   :  { %2268 = vtanh.f32 %v2641_v18 }
 0x774   :  { %v2267_v20 = vpop.eup %2266 }
 0x775   :  { %585 = vrot.lane.b32.xlu0 %v2267_v20, %s2398_s19 }
 0x77a   :  { %v2269_v21 = vpop.eup %2268 }
 0x77b   :  { %650 = vrot.lane.b32.xlu1 %v2269_v21, %s2398_s19 }
 0x7e7   :  { %v586_v23 = vpop.permute.xlu0 %585 }
 0x7e8   :  { %v588_v22 = vmul.f32 %v2263_v2, %v586_v23 }
 0x7ea   :  { %v655_v24 = vpack.c.bf16 %v588_v22, %v588_v22 }
 0x7ec   :  { %657 = vrot.lane.b32.xlu0 %v655_v24, %s2399_s20 }
 0x7ed   :  { %v651_v25 = vpop.permute.xlu1 %650 }
 0x7ee   :  { %v653_v26 = vmul.f32 %v2265_v7, %v651_v25 }
 0x7f0   :  { %v654_v27 = vpack.c.bf16 %v653_v26, %v653_v26 }
 0x7f2   :  { %703 = vrot.lane.b32.xlu1 %v654_v27, %s2399_s20 }
 0x85e   :  { %v658_v19 = vpop.permute.xlu0 %657 }
 0x85f   :  { %2062 = vmatmul.mubr.msk.bf16.vlgmr.msra.gmra.mrb[16].mxu1 %vm200_vm3, %v658_v19 }
 0x860   :  { %2074 = vmatpush3.bf16.msra.mxu1 %v2478_v3  ;;  %2077 = vmatprep.mubr.msk.bf16.mxu1 %vm2396_vm0, %v2395_v0 }
 0x861   :  { %2075 = vmatprep.subr.bf16.mxu1 %v2395_v0 }
 0x864   :  { %2076 = vmatpush3.bf16.msra.mxu1 %v2493_v6  ;;  %v704_v28 = vpop.permute.xlu1 %703 }
 0x865   :  { %2070 = vmatmul.mubr.msk.bf16.vlgmr.msra.gmra.mrb[20].mxu0 %vm200_vm3, %v704_v28  ;;  %2089 = vmatprep.subr.bf16.mxu1 %v2395_v0 }
 0x866   :  { %2082 = vmatpush3.bf16.msra.mxu0 %v2520_v29  ;;  %2085 = vmatprep.mubr.msk.bf16.mxu0 %vm2396_vm0, %v2395_v0 }
 0x867   :  { %2078 = vmatmul.mubr.msk.bf16.vlgmr.msra.gmra.mrb[20].mxu1 %vm200_vm3, %v704_v28  ;;  %2083 = vmatprep.subr.bf16.mxu0 %v2395_v0 }
 0x868   :  { %2090 = vmatpush3.bf16.msra.mxu1 %v2525_v30  ;;  %2093 = vmatprep.mubr.msk.bf16.mxu1 %vm2396_vm0, %v2395_v0 }
 0x869   :  { %2091 = vmatprep.subr.bf16.mxu1 %v2395_v0 }
 0x86a   :  { %2084 = vmatpush3.bf16.msra.mxu0 %v2538_v33 }
 0x86b   :  { %2097 = vmatprep.subr.bf16.mxu0 %v2395_v0 }
 0x86c   :  { %2092 = vmatpush3.bf16.msra.mxu1 %v2543_v34 }
 0x86d   :  { %2105 = vmatprep.subr.bf16.mxu1 %v2395_v0 }
 0x932   :  { %v696_v31 = vpop.f32.mrb[16].mxu1 }
 0x933   :  { %v2063_v32 = vpop.f32.mrb[17].mxu1 }
 0x934   :  { %v699_v35 = vpop.f32.mrb[18].mxu1 }
 0x935   :  { %v2064_v36 = vpop.f32.mrb[19].mxu1 }
 0x938   :  { %v742_v37 = vpop.f32.mrb[20].mxu0 }
 0x939   :  { %v743_v43 = vadd.f32 %v742_v37, %v696_v31  ;;  %v2071_v44 = vpop.f32.mrb[21].mxu0 }
 0x93a   :  { %v745_v45 = vpop.f32.mrb[22].mxu0  ;;  %v807_v46 = vpop.f32.mrb[20].mxu1 }
 0x93b   :  { %v748_v47 = vadd.f32 %v2590_v49, %v743_v43  ;;  %v813_v48 = vadd.f32 %v807_v46, %v150_v38  ;;  %v2072_v50 = vpop.f32.mrb[23].mxu0  ;;  %v2079_v51 = vpop.f32.mrb[21].mxu1  ;;  %v155_v38 = vadd.f32 %v2503_v8, %v2565_v40 }
 0x93c   :  { %v810_v52 = vpop.f32.mrb[22].mxu1 }
 0x93d   :  { %2270 = vtanh.f32 %v748_v47  ;;  %v2080_v53 = vpop.f32.mrb[23].mxu1  ;;  %v1874_v12 = vmul.f32 -1.442695, %v748_v47  ;;  %v1876_v56 = vmul.f32 -1.442695, %v813_v48 }
 0x93e   :  { %2272 = vtanh.f32 %v813_v48 }
 0x93f   :  { %2274 = vpow2.f32 %v1874_v12 }
 0x940   :  { %2276 = vpow2.f32 %v1876_v56 }
 0x947   :  { %v2271_v54 = vpop.eup %2270 }
 0x948   :  { %v2273_v55 = vpop.eup %2272  ;;  %758 = vrot.lane.b32.xlu0 %v2271_v54, %s2398_s19 }
 0x949   :  { %823 = vrot.lane.b32.xlu1 %v2273_v55, %s2398_s19  ;;  %v2275_v57 = vpop.eup %2274 }
 0x94a   :  { %v2277_v58 = vpop.eup %2276  ;;  %v752_v59 = vadd.f32 1.0, %v2275_v57 }
 0x94b   :  { %v817_v60 = vadd.f32 1.0, %v2277_v58 }
 0x94c   :  { %2278 = vrcp.f32 %v752_v59 }
 0x94d   :  { %2280 = vrcp.f32 %v817_v60 }
 0x956   :  { %v2279_v61 = vpop.eup %2278 }
 0x957   :  { %v2281_v63 = vpop.eup %2280  ;;  %v756_v4 = vmul.f32 %v2279_v61, %v2637_v15 }
 0x958   :  { %v821_v5 = vmul.f32 %v2281_v63, %v2641_v18 }
 0x9ba   :  { %v759_v62 = vpop.permute.xlu0 %758 }
 0x9bb   :  { %v824_v1 = vpop.permute.xlu1 %823  ;;  %v761_v9 = vmul.f32 %v2279_v61, %v759_v62 }
 0x9bc   :  { %v826_v2 = vmul.f32 %v2281_v63, %v824_v1 }
 0x9bd   :  { %763 = vrot.lane.b32.xlu0 %v761_v9, %s2399_s20 }
 0x9be   :  { %828 = vrot.lane.b32.xlu1 %v826_v2, %s2399_s20 }
 0xa2f   :  { %v764_v7 = vpop.permute.xlu0 %763 }
 0xa30   :  { %v829_v10 = vpop.permute.xlu1 %828  ;;  %v2678_v11 = vadd.f32 %v764_v7, %v756_v4 }
 0xa31   :  { %v2680_v13 = vadd.f32 %v829_v10, %v821_v5 }
 0xa32   :  { %2282 = vtanh.f32 %v2678_v11 }
 0xa33   :  { %2284 = vtanh.f32 %v2680_v13 }
 0xa3c   :  { %v2283_v14 = vpop.eup %2282 }
 0xa3d   :  { %v2285_v16 = vpop.eup %2284  ;;  %769 = vrot.lane.b32.xlu0 %v2283_v14, %s2398_s19 }
 0xa3e   :  { %834 = vrot.lane.b32.xlu1 %v2285_v16, %s2398_s19 }
 0xaaf   :  { %v770_v17 = vpop.permute.xlu0 %769 }
 0xab0   :  { %v835_v15 = vpop.permute.xlu1 %834  ;;  %v772_v20 = vmul.f32 %v2279_v61, %v770_v17 }
 0xab1   :  { %v837_v18 = vmul.f32 %v2281_v63, %v835_v15 }
 0xab2   :  { %v839_v21 = vpack.c.bf16 %v772_v20, %v772_v20 }
 0xab3   :  { %v838_v23 = vpack.c.bf16 %v837_v18, %v837_v18 }
 0xab4   :  { %841 = vrot.lane.b32.xlu0 %v839_v21, %s2399_s20 }
 0xab5   :  { %887 = vrot.lane.b32.xlu1 %v838_v23, %s2399_s20 }
 0xb26   :  { %v842_v22 = vpop.permute.xlu0 %841 }
 0xb27   :  { %v888_v24 = vpop.permute.xlu1 %887  ;;  %2086 = vmatmul.mubr.msk.bf16.vlgmr.msra.gmra.mrb[24].mxu0 %vm200_vm3, %v842_v22 }
 0xb28   :  { %2094 = vmatmul.mubr.msk.bf16.vlgmr.msra.gmra.mrb[24].mxu1 %vm200_vm3, %v888_v24  ;;  %2098 = vmatpush3.bf16.msra.mxu0 %v2478_v3 }
 0xb29   :  { %2099 = vmatprep.subr.bf16.mxu0 %v2395_v0  ;;  %2101 = vmatprep.mubr.msk.bf16.mxu0 %vm2396_vm0, %v2395_v0 }
 0xb2a   :  { %2106 = vmatpush3.bf16.msra.mxu1 %v2520_v29  ;;  %2109 = vmatprep.mubr.msk.bf16.mxu1 %vm2396_vm0, %v2395_v0 }
 0xb2b   :  { %2107 = vmatprep.subr.bf16.mxu1 %v2395_v0 }
 0xb2c   :  { %2100 = vmatpush3.bf16.msra.mxu0 %v2493_v6 }
 0xb2d   :  { %2113 = vmatprep.subr.bf16.mxu0 %v2395_v0 }
 0xb2e   :  { %2108 = vmatpush3.bf16.msra.mxu1 %v2538_v33 }
 0xb2f   :  { %2102 = vmatmul.mubr.msk.bf16.vlgmr.msra.gmra.mrb[28].mxu0 %vm200_vm3, %v888_v24  ;;  %2121 = vmatprep.subr.bf16.mxu1 %v2395_v0 }
 0xb30   :  { %2114 = vmatpush3.bf16.msra.mxu0 %v2525_v30  ;;  %2117 = vmatprep.mubr.msk.bf16.mxu0 %vm2396_vm0, %v2395_v0 }
 0xb31   :  { %2115 = vmatprep.subr.bf16.mxu0 %v2395_v0 }
 0xb34   :  { %2116 = vmatpush3.bf16.msra.mxu0 %v2543_v34 }
 0xb35   :  { %2129 = vmatprep.subr.bf16.mxu0 %v2395_v0 }
 0xbfa   :  { %v880_v25 = vpop.f32.mrb[24].mxu0 }
 0xbfb   :  { %v926_v26 = vpop.f32.mrb[24].mxu1  ;;  %v2087_v27 = vpop.f32.mrb[25].mxu0 }
 0xbfc   :  { %v927_v19 = vadd.f32 %v926_v26, %v880_v25  ;;  %v2095_v28 = vpop.f32.mrb[25].mxu1  ;;  %v883_v31 = vpop.f32.mrb[26].mxu0  ;;  %v158_v26 = vadd.f32 %v2503_v8, %v2569_v42 }
 0xbfd   :  { %v929_v32 = vpop.f32.mrb[26].mxu1  ;;  %v2088_v35 = vpop.f32.mrb[27].mxu0 }
 0xbfe   :  { %v932_v36 = vadd.f32 %v2590_v49, %v927_v19  ;;  %v2096_v37 = vpop.f32.mrb[27].mxu1 }
 0xc00   :  { %2286 = vtanh.f32 %v932_v36  ;;  %v1879_v51 = vmul.f32 -1.442695, %v932_v36 }
 0xc02   :  { %v991_v43 = vpop.f32.mrb[28].mxu0 }
 0xc03   :  { %v997_v44 = vadd.f32 %v991_v43, %v155_v38  ;;  %v2103_v45 = vpop.f32.mrb[29].mxu0 }
 0xc04   :  { %v994_v46 = vpop.f32.mrb[30].mxu0 }
 0xc05   :  { %2288 = vtanh.f32 %v997_v44  ;;  %v2104_v47 = vpop.f32.mrb[31].mxu0  ;;  %v1881_v52 = vmul.f32 -1.442695, %v997_v44 }
 0xc06   :  { %2290 = vpow2.f32 %v1879_v51 }
 0xc07   :  { %2292 = vpow2.f32 %v1881_v52 }
 0xc0a   :  { %v2287_v48 = vpop.eup %2286 }
 0xc0b   :  { %942 = vrot.lane.b32.xlu0 %v2287_v48, %s2398_s19 }
 0xc0f   :  { %v2289_v50 = vpop.eup %2288 }
 0xc10   :  { %1007 = vrot.lane.b32.xlu1 %v2289_v50, %s2398_s19  ;;  %v2291_v53 = vpop.eup %2290 }
 0xc11   :  { %v936_v54 = vadd.f32 1.0, %v2291_v53  ;;  %v2293_v55 = vpop.eup %2292 }
 0xc12   :  { %v1001_v40 = vadd.f32 1.0, %v2293_v55 }
 0xc13   :  { %2294 = vrcp.f32 %v936_v54 }
 0xc14   :  { %2296 = vrcp.f32 %v1001_v40 }
 0xc1d   :  { %v2295_v12 = vpop.eup %2294 }
 0xc1e   :  { %v2297_v58 = vpop.eup %2296  ;;  %v940_v61 = vmul.f32 %v2295_v12, %v2678_v11 }
 0xc1f   :  { %v1005_v1 = vmul.f32 %v2297_v58, %v2680_v13 }
 0xc7d   :  { %v943_v56 = vpop.permute.xlu0 %942 }
 0xc7e   :  { %v945_v57 = vmul.f32 %v2295_v12, %v943_v56 }
 0xc80   :  { %947 = vrot.lane.b32.xlu0 %v945_v57, %s2399_s20 }
 0xc82   :  { %v1008_v59 = vpop.permute.xlu1 %1007 }
 0xc83   :  { %v1010_v60 = vmul.f32 %v2297_v58, %v1008_v59 }
 0xc85   :  { %1012 = vrot.lane.b32.xlu1 %v1010_v60, %s2399_s20 }
 0xcf2   :  { %v948_v62 = vpop.permute.xlu0 %947 }
 0xcf3   :  { %v2717_v63 = vadd.f32 %v948_v62, %v940_v61 }
 0xcf5   :  { %2298 = vtanh.f32 %v2717_v63 }
 0xcf7   :  { %v1013_v9 = vpop.permute.xlu1 %1012 }
 0xcf8   :  { %v2721_v2 = vadd.f32 %v1013_v9, %v1005_v1 }
 0xcfa   :  { %2300 = vtanh.f32 %v2721_v2 }
 0xcff   :  { %v2299_v4 = vpop.eup %2298 }
 0xd00   :  { %953 = vrot.lane.b32.xlu0 %v2299_v4, %s2398_s19 }
 0xd04   :  { %v2301_v5 = vpop.eup %2300 }
 0xd05   :  { %1018 = vrot.lane.b32.xlu1 %v2301_v5, %s2398_s19 }
 0xd72   :  { %v954_v7 = vpop.permute.xlu0 %953 }
 0xd73   :  { %v956_v10 = vmul.f32 %v2295_v12, %v954_v7 }
 0xd75   :  { %v1023_v11 = vpack.c.bf16 %v956_v10, %v956_v10 }
 0xd77   :  { %1025 = vrot.lane.b32.xlu0 %v1023_v11, %s2399_s20  ;;  %v1019_v14 = vpop.permute.xlu1 %1018 }
 0xd78   :  { %v1021_v16 = vmul.f32 %v2297_v58, %v1019_v14 }
 0xd7a   :  { %v1022_v17 = vpack.c.bf16 %v1021_v16, %v1021_v16 }
 0xd7c   :  { %1071 = vrot.lane.b32.xlu1 %v1022_v17, %s2399_s20 }
 0xde9   :  { %v1026_v13 = vpop.permute.xlu0 %1025 }
 0xdea   :  { %2110 = vmatmul.mubr.msk.bf16.vlgmr.msra.gmra.mrb[28].mxu1 %vm200_vm3, %v1026_v13  ;;  %v163_v13 = vadd.f32 %v2563_v39, %v2503_v8 }
 0xdeb   :  { %2122 = vmatpush3.bf16.msra.mxu1 %v2478_v3  ;;  %2125 = vmatprep.mubr.msk.bf16.mxu1 %vm2396_vm0, %v2395_v0 }
 0xdec   :  { %2123 = vmatprep.subr.bf16.mxu1 %v2395_v0 }
 0xdee   :  { %v1072_v15 = vpop.permute.xlu1 %1071 }
 0xdef   :  { %2124 = vmatpush3.bf16.msra.mxu1 %v2493_v6  ;;  %2118 = vmatmul.mubr.msk.bf16.vlgmr.msra.gmra.mrb[32].mxu0 %vm200_vm3, %v1072_v15 }
 0xdf0   :  { %2137 = vmatprep.subr.bf16.mxu1 %v2395_v0  ;;  %2130 = vmatpush3.bf16.msra.mxu0 %v2520_v29 }
 0xdf1   :  { %2131 = vmatprep.subr.bf16.mxu0 %v2395_v0  ;;  %2133 = vmatprep.mubr.msk.bf16.mxu0 %vm2396_vm0, %v2395_v0 }
 0xdf2   :  { %2126 = vmatmul.mubr.msk.bf16.vlgmr.msra.gmra.mrb[32].mxu1 %vm200_vm3, %v1072_v15 }
 0xdf3   :  { %2138 = vmatpush3.bf16.msra.mxu1 %v2525_v30  ;;  %2141 = vmatprep.mubr.msk.bf16.mxu1 %vm2396_vm0, %v2395_v0 }
 0xdf4   :  { %2139 = vmatprep.subr.bf16.mxu1 %v2395_v0  ;;  %2132 = vmatpush3.bf16.msra.mxu0 %v2538_v33 }
 0xdf5   :  { %2145 = vmatprep.subr.bf16.mxu0 %v2395_v0 }
 0xdf7   :  { %2140 = vmatpush3.bf16.msra.mxu1 %v2543_v34 }
 0xdf8   :  { %2153 = vmatprep.subr.bf16.mxu1 %v2395_v0 }
 0xebd   :  { %v1064_v20 = vpop.f32.mrb[28].mxu1 }
 0xebe   :  { %v2111_v18 = vpop.f32.mrb[29].mxu1 }
 0xebf   :  { %v1067_v21 = vpop.f32.mrb[30].mxu1 }
 0xec0   :  { %v2112_v23 = vpop.f32.mrb[31].mxu1 }
 0xec2   :  { %v1110_v22 = vpop.f32.mrb[32].mxu0 }
 0xec3   :  { %v1111_v24 = vadd.f32 %v1110_v22, %v1064_v20  ;;  %v2119_v25 = vpop.f32.mrb[33].mxu0 }
 0xec4   :  { %v1113_v27 = vpop.f32.mrb[34].mxu0 }
 0xec5   :  { %v1116_v19 = vadd.f32 %v2590_v49, %v1111_v24  ;;  %v1175_v28 = vpop.f32.mrb[32].mxu1  ;;  %v2120_v31 = vpop.f32.mrb[35].mxu0 }
 0xec6   :  { %v1181_v32 = vadd.f32 %v1175_v28, %v158_v26  ;;  %v2127_v35 = vpop.f32.mrb[33].mxu1 }
 0xec7   :  { %2302 = vtanh.f32 %v1116_v19  ;;  %v1178_v36 = vpop.f32.mrb[34].mxu1  ;;  %v1884_v44 = vmul.f32 -1.442695, %v1116_v19 }
 0xec8   :  { %2304 = vtanh.f32 %v1181_v32  ;;  %v2128_v37 = vpop.f32.mrb[35].mxu1  ;;  %v1886_v45 = vmul.f32 -1.442695, %v1181_v32 }
 0xec9   :  { %2306 = vpow2.f32 %v1884_v44 }
 0xeca   :  { %2308 = vpow2.f32 %v1886_v45 }
 0xed1   :  { %v2303_v38 = vpop.eup %2302 }
 0xed2   :  { %v2305_v43 = vpop.eup %2304  ;;  %1126 = vrot.lane.b32.xlu0 %v2303_v38, %s2398_s19 }
 0xed3   :  { %1191 = vrot.lane.b32.xlu1 %v2305_v43, %s2398_s19  ;;  %v2307_v42 = vpop.eup %2306 }
 0xed4   :  { %v2309_v46 = vpop.eup %2308  ;;  %v1120_v47 = vadd.f32 1.0, %v2307_v42 }
 0xed5   :  { %v1185_v48 = vadd.f32 1.0, %v2309_v46 }
 0xed6   :  { %2310 = vrcp.f32 %v1120_v47 }
 0xed7   :  { %2312 = vrcp.f32 %v1185_v48 }
 0xee0   :  { %v2311_v50 = vpop.eup %2310 }
 0xee1   :  { %v2313_v52 = vpop.eup %2312  ;;  %v1124_v40 = vmul.f32 %v2311_v50, %v2717_v63 }
 0xee2   :  { %v1189_v12 = vmul.f32 %v2313_v52, %v2721_v2 }
 0xf44   :  { %v1127_v51 = vpop.permute.xlu0 %1126 }
 0xf45   :  { %v1192_v53 = vpop.permute.xlu1 %1191  ;;  %v1129_v54 = vmul.f32 %v2311_v50, %v1127_v51 }
 0xf46   :  { %v1194_v55 = vmul.f32 %v2313_v52, %v1192_v53 }
 0xf47   :  { %1131 = vrot.lane.b32.xlu0 %v1129_v54, %s2399_s20 }
 0xf48   :  { %1196 = vrot.lane.b32.xlu1 %v1194_v55, %s2399_s20 }
 0xfb9   :  { %v1132_v56 = vpop.permute.xlu0 %1131 }
 0xfba   :  { %v1197_v57 = vpop.permute.xlu1 %1196  ;;  %v2758_v58 = vadd.f32 %v1132_v56, %v1124_v40  ;;  %v2362_v40 = vld [vmem:[%s2897_s3] sm:$0xff]   ;;  %v2363_v56 = vld [vmem:[%s2897_s3 + $0x8] sm:$0xff]  }
 0xfbb   :  { %v2760_v59 = vadd.f32 %v1197_v57, %v1189_v12  ;;  %v2364_v57 = vld [vmem:[%s2899_s5] sm:$0xff]  }
 0xfbc   :  { %2314 = vtanh.f32 %v2758_v58 }
 0xfbd   :  { %2316 = vtanh.f32 %v2760_v59 }
 0xfc6   :  { %v2315_v60 = vpop.eup %2314 }
 0xfc7   :  { %v2317_v61 = vpop.eup %2316  ;;  %1137 = vrot.lane.b32.xlu0 %v2315_v60, %s2398_s19  ;;  %v2367_v60 = vld [vmem:[%s2898_s4 + $0x8] sm:$0xff]  }
 0xfc8   :  { %1202 = vrot.lane.b32.xlu1 %v2317_v61, %s2398_s19 }
0x1039   :  { %v1138_v62 = vpop.permute.xlu0 %1137 }
0x103a   :  { %v1203_v63 = vpop.permute.xlu1 %1202  ;;  %v1140_v1 = vmul.f32 %v2311_v50, %v1138_v62 }
0x103b   :  { %v1205_v9 = vmul.f32 %v2313_v52, %v1203_v63 }
0x103c   :  { %v1207_v2 = vpack.c.bf16 %v1140_v1, %v1140_v1 }
0x103d   :  { %v1206_v4 = vpack.c.bf16 %v1205_v9, %v1205_v9 }
0x103e   :  { %1209 = vrot.lane.b32.xlu0 %v1207_v2, %s2399_s20 }
0x103f   :  { %1255 = vrot.lane.b32.xlu1 %v1206_v4, %s2399_s20 }
0x10b0   :  { %v1210_v5 = vpop.permute.xlu0 %1209 }
0x10b1   :  { %v1256_v7 = vpop.permute.xlu1 %1255  ;;  %2134 = vmatmul.mubr.msk.bf16.vlgmr.msra.gmra.mrb[36].mxu0 %vm200_vm3, %v1210_v5  ;;  %v2368_v5 = vld [vmem:[%s2896_s2] ss:$0 sm:$0xff] }
0x10b2   :  { %2142 = vmatmul.mubr.msk.bf16.vlgmr.msra.gmra.mrb[36].mxu1 %vm200_vm3, %v1256_v7  ;;  %2146 = vmatpush3.bf16.msra.mxu0 %v2478_v3 }
0x10b3   :  { %2147 = vmatprep.subr.bf16.mxu0 %v2395_v0  ;;  %2149 = vmatprep.mubr.msk.bf16.mxu0 %vm2396_vm0, %v2395_v0 }
0x10b4   :  { %2154 = vmatpush3.bf16.msra.mxu1 %v2520_v29  ;;  %2157 = vmatprep.mubr.msk.bf16.mxu1 %vm2396_vm0, %v2395_v0 }
0x10b5   :  { %2155 = vmatprep.subr.bf16.mxu1 %v2395_v0 }
0x10b6   :  { %2148 = vmatpush3.bf16.msra.mxu0 %v2493_v6 }
0x10b7   :  { %2161 = vmatprep.subr.bf16.mxu0 %v2395_v0 }
0x10b8   :  { %2156 = vmatpush3.bf16.msra.mxu1 %v2538_v33 }
0x10b9   :  { %2150 = vmatmul.mubr.msk.bf16.vlgmr.msra.gmra.mrb[40].mxu0 %vm200_vm3, %v1256_v7  ;;  %2169 = vmatprep.subr.bf16.mxu1 %v2395_v0  ;;  %v166_v7 = vadd.f32 %v2368_v5, %v2567_v41 }
0x10ba   :  { %2162 = vmatpush3.bf16.msra.mxu0 %v2525_v30  ;;  %2165 = vmatprep.mubr.msk.bf16.mxu0 %vm2396_vm0, %v2395_v0 }
0x10bb   :  { %2163 = vmatprep.subr.bf16.mxu0 %v2395_v0 }
0x10be   :  { %2164 = vmatpush3.bf16.msra.mxu0 %v2543_v34 }
0x10bf   :  { %2177 = vmatprep.subr.bf16.mxu0 %v2395_v0 }
0x1184   :  { %v1248_v3 = vpop.f32.mrb[36].mxu0 }
0x1185   :  { %v1294_v6 = vpop.f32.mrb[36].mxu1  ;;  %v2135_v29 = vpop.f32.mrb[37].mxu0 }
0x1186   :  { %v1295_v10 = vadd.f32 %v1294_v6, %v1248_v3  ;;  %v2143_v33 = vpop.f32.mrb[37].mxu1  ;;  %v1251_v11 = vpop.f32.mrb[38].mxu0 }
0x1187   :  { %v1297_v14 = vpop.f32.mrb[38].mxu1  ;;  %v2136_v16 = vpop.f32.mrb[39].mxu0 }
0x1188   :  { %v1300_v17 = vadd.f32 %v2590_v49, %v1295_v10  ;;  %v2144_v30 = vpop.f32.mrb[39].mxu1 }
0x118a   :  { %2318 = vtanh.f32 %v1300_v17  ;;  %v1889_v24 = vmul.f32 -1.442695, %v1300_v17 }
0x118c   :  { %v1359_v15 = vpop.f32.mrb[40].mxu0 }
0x118d   :  { %v1365_v20 = vadd.f32 %v1359_v15, %v163_v13  ;;  %v2151_v34 = vpop.f32.mrb[41].mxu0 }
0x118e   :  { %v1362_v18 = vpop.f32.mrb[42].mxu0 }
0x118f   :  { %2320 = vtanh.f32 %v1365_v20  ;;  %v2152_v21 = vpop.f32.mrb[43].mxu0  ;;  %v1891_v25 = vmul.f32 -1.442695, %v1365_v20 }
0x1190   :  { %2322 = vpow2.f32 %v1889_v24 }
0x1191   :  { %2324 = vpow2.f32 %v1891_v25 }
0x1194   :  { %v2319_v23 = vpop.eup %2318 }
0x1195   :  { %1310 = vrot.lane.b32.xlu0 %v2319_v23, %s2398_s19 }
0x1199   :  { %v2321_v22 = vpop.eup %2320 }
0x119a   :  { %1375 = vrot.lane.b32.xlu1 %v2321_v22, %s2398_s19  ;;  %v2323_v26 = vpop.eup %2322 }
0x119b   :  { %v1304_v27 = vadd.f32 1.0, %v2323_v26  ;;  %v2325_v19 = vpop.eup %2324 }
0x119c   :  { %v1369_v8 = vadd.f32 1.0, %v2325_v19 }
0x119d   :  { %2326 = vrcp.f32 %v1304_v27 }
0x119e   :  { %2328 = vrcp.f32 %v1369_v8 }
0x11a7   :  { %v2327_v39 = vpop.eup %2326 }
0x11a8   :  { %v2329_v32 = vpop.eup %2328  ;;  %v1308_v37 = vmul.f32 %v2327_v39, %v2758_v58  ;;  %v2365_v58 = vld [vmem:[%s2898_s4] sm:$0xff]  }
0x11a9   :  { %v1373_v44 = vmul.f32 %v2329_v32, %v2760_v59  ;;  %v2366_v59 = vld [vmem:[%s2899_s5 + $0x8] sm:$0xff]  }
0x1207   :  { %v1311_v28 = vpop.permute.xlu0 %1310 }
0x1208   :  { %v1313_v31 = vmul.f32 %v2327_v39, %v1311_v28 }
0x120a   :  { %1315 = vrot.lane.b32.xlu0 %v1313_v31, %s2399_s20 }
0x120c   :  { %v1376_v35 = vpop.permute.xlu1 %1375 }
0x120d   :  { %v1378_v36 = vmul.f32 %v2329_v32, %v1376_v35 }
0x120f   :  { %1380 = vrot.lane.b32.xlu1 %v1378_v36, %s2399_s20 }
0x127c   :  { %v1316_v38 = vpop.permute.xlu0 %1315 }
0x127d   :  { %v2797_v43 = vadd.f32 %v1316_v38, %v1308_v37 }
0x127f   :  { %2330 = vtanh.f32 %v2797_v43 }
0x1281   :  { %v1381_v45 = vpop.permute.xlu1 %1380 }
0x1282   :  { %v2801_v42 = vadd.f32 %v1381_v45, %v1373_v44 }
0x1284   :  { %2332 = vtanh.f32 %v2801_v42 }
0x1289   :  { %v2331_v46 = vpop.eup %2330 }
0x128a   :  { %1321 = vrot.lane.b32.xlu0 %v2331_v46, %s2398_s19 }
0x128e   :  { %v2333_v47 = vpop.eup %2332 }
0x128f   :  { %1386 = vrot.lane.b32.xlu1 %v2333_v47, %s2398_s19 }
0x12fc   :  { %v1322_v48 = vpop.permute.xlu0 %1321 }
0x12fd   :  { %v1324_v50 = vmul.f32 %v2327_v39, %v1322_v48 }
0x12ff   :  { %v1391_v51 = vpack.c.bf16 %v1324_v50, %v1324_v50 }
0x1301   :  { %1393 = vrot.lane.b32.xlu0 %v1391_v51, %s2399_s20  ;;  %v1387_v52 = vpop.permute.xlu1 %1386 }
0x1302   :  { %v1389_v53 = vmul.f32 %v2329_v32, %v1387_v52 }
0x1304   :  { %v1390_v54 = vpack.c.bf16 %v1389_v53, %v1389_v53 }
0x1306   :  { %1439 = vrot.lane.b32.xlu1 %v1390_v54, %s2399_s20 }
0x1373   :  { %v1394_v55 = vpop.permute.xlu0 %1393 }
0x1374   :  { %2158 = vmatmul.mubr.msk.bf16.vlgmr.msra.gmra.mrb[40].mxu1 %vm200_vm3, %v1394_v55  ;;  %v2369_v55 = vld [vmem:[%s2900_s6] ss:$0 sm:$0xff] }
0x1375   :  { %2170 = vmatpush3.bf16.msra.mxu1 %v2362_v40  ;;  %2173 = vmatprep.mubr.msk.bf16.mxu1 %vm2396_vm0, %v2395_v0 }
0x1376   :  { %2171 = vmatprep.subr.bf16.mxu1 %v2395_v0 }
0x1378   :  { %v1440_v12 = vpop.permute.xlu1 %1439 }
0x1379   :  { %2172 = vmatpush3.bf16.msra.mxu1 %v2363_v56  ;;  %2166 = vmatmul.mubr.msk.bf16.vlgmr.msra.gmra.mrb[44].mxu0 %vm200_vm3, %v1440_v12 }
0x137a   :  { %2185 = vmatprep.subr.bf16.mxu1 %v2395_v0  ;;  %2178 = vmatpush3.bf16.msra.mxu0 %v2364_v57 }
0x137b   :  { %2179 = vmatprep.subr.bf16.mxu0 %v2395_v0  ;;  %2181 = vmatprep.mubr.msk.bf16.mxu0 %vm2396_vm0, %v2395_v0 }
0x137c   :  { %2174 = vmatmul.mubr.msk.bf16.vlgmr.msra.gmra.mrb[44].mxu1 %vm200_vm3, %v1440_v12 }
0x137d   :  { %2186 = vmatpush3.bf16.msra.mxu1 %v2365_v58  ;;  %2189 = vmatprep.mubr.msk.bf16.mxu1 %vm2396_vm0, %v2395_v0 }
0x137e   :  { %2187 = vmatprep.subr.bf16.mxu1 %v2395_v0  ;;  %2180 = vmatpush3.bf16.msra.mxu0 %v2366_v59 }
0x137f   :  { %2193 = vmatprep.subr.bf16.mxu0 %v2395_v0 }
0x1381   :  { %2188 = vmatpush3.bf16.msra.mxu1 %v2367_v60 }
0x1382   :  { %2201 = vmatprep.subr.bf16.mxu1 %v2395_v0 }
0x1447   :  { %v1432_v61 = vpop.f32.mrb[40].mxu1 }
0x1448   :  { %v2159_v62 = vpop.f32.mrb[41].mxu1 }
0x1449   :  { %v1435_v63 = vpop.f32.mrb[42].mxu1 }
0x144a   :  { %v2160_v1 = vpop.f32.mrb[43].mxu1 }
0x144c   :  { %v1478_v9 = vpop.f32.mrb[44].mxu0 }
0x144d   :  { %v1479_v2 = vadd.f32 %v1478_v9, %v1432_v61  ;;  %v2167_v4 = vpop.f32.mrb[45].mxu0 }
0x144e   :  { %v1481_v3 = vpop.f32.mrb[46].mxu0  ;;  %v2227_v4 = vld [vmem:[%s2901_s7 + $0x8] sm:$0xff]  }
0x144f   :  { %v1484_v6 = vadd.f32 %v2590_v49, %v1479_v2  ;;  %v1543_v29 = vpop.f32.mrb[44].mxu1  ;;  %v2168_v10 = vpop.f32.mrb[47].mxu0  ;;  %v2226_v2 = vld [vmem:[%s2901_s7] sm:$0xff]  }
0x1450   :  { %v1549_v33 = vadd.f32 %v1543_v29, %v166_v7  ;;  %v2175_v11 = vpop.f32.mrb[45].mxu1  ;;  %v2228_v7 = vld [vmem:[%s2903_s9] sm:$0xff]  }
0x1451   :  { %2334 = vtanh.f32 %v1484_v6  ;;  %v1546_v14 = vpop.f32.mrb[46].mxu1  ;;  %v1894_v13 = vmul.f32 -1.442695, %v1484_v6  ;;  %v1900_v11 = vld [vmem:[%s2902_s8] ss:$0 sm:$0xff] }
0x1452   :  { %2336 = vtanh.f32 %v1549_v33  ;;  %v2176_v16 = vpop.f32.mrb[47].mxu1  ;;  %v1896_v15 = vmul.f32 -1.442695, %v1549_v33  ;;  %v2229_v33 = vld [vmem:[%s2903_s9 + $0x8] sm:$0xff]  }
0x1453   :  { %2338 = vpow2.f32 %v1894_v13 }
0x1454   :  { %2340 = vpow2.f32 %v1896_v15 }
0x145b   :  { %v2335_v17 = vpop.eup %2334 }
0x145c   :  { %v2337_v30 = vpop.eup %2336  ;;  %1494 = vrot.lane.b32.xlu0 %v2335_v17, %s2398_s19 }
0x145d   :  { %1559 = vrot.lane.b32.xlu1 %v2337_v30, %s2398_s19  ;;  %v2339_v41 = vpop.eup %2338 }
0x145e   :  { %v2341_v49 = vpop.eup %2340  ;;  %v1488_v20 = vadd.f32 1.0, %v2339_v41  ;;  %v1904_v41 = vld [vmem:[%s2904_s10] ss:$0 sm:$0xff] }
0x145f   :  { %v1553_v34 = vadd.f32 1.0, %v2341_v49 }
0x1460   :  { %2342 = vrcp.f32 %v1488_v20 }
0x1461   :  { %2344 = vrcp.f32 %v1553_v34 }
0x146a   :  { %v2343_v18 = vpop.eup %2342 }
0x146b   :  { %v2345_v23 = vpop.eup %2344  ;;  %v1492_v26 = vmul.f32 %v2343_v18, %v2797_v43 }
0x146c   :  { %v1557_v27 = vmul.f32 %v2345_v23, %v2801_v42 }
0x14ce   :  { %v1495_v21 = vpop.permute.xlu0 %1494 }
0x14cf   :  { %v1560_v22 = vpop.permute.xlu1 %1559  ;;  %v1497_v24 = vmul.f32 %v2343_v18, %v1495_v21 }
0x14d0   :  { %v1562_v25 = vmul.f32 %v2345_v23, %v1560_v22 }
0x14d1   :  { %1499 = vrot.lane.b32.xlu0 %v1497_v24, %s2399_s20 }
0x14d2   :  { %1564 = vrot.lane.b32.xlu1 %v1562_v25, %s2399_s20 }
0x1543   :  { %v1500_v19 = vpop.permute.xlu0 %1499 }
0x1544   :  { %v1565_v8 = vpop.permute.xlu1 %1564  ;;  %v1502_v39 = vadd.f32 %v1500_v19, %v1492_v26 }
0x1545   :  { %v1567_v28 = vadd.f32 %v1565_v8, %v1557_v27 }
0x1546   :  { %2346 = vtanh.f32 %v1502_v39 }
0x1547   :  { %2348 = vtanh.f32 %v1567_v28 }
0x1550   :  { %v2347_v31 = vpop.eup %2346 }
0x1551   :  { %v2349_v32 = vpop.eup %2348  ;;  %1505 = vrot.lane.b32.xlu0 %v2347_v31, %s2398_s19 }
0x1552   :  { %1570 = vrot.lane.b32.xlu1 %v2349_v32, %s2398_s19 }
0x15c3   :  { %v1506_v35 = vpop.permute.xlu0 %1505 }
0x15c4   :  { %v1571_v36 = vpop.permute.xlu1 %1570  ;;  %v1508_v37 = vmul.f32 %v2343_v18, %v1506_v35 }
0x15c5   :  { %v1573_v38 = vmul.f32 %v2345_v23, %v1571_v36 }
0x15c6   :  { %v1575_v44 = vpack.c.bf16 %v1508_v37, %v1508_v37 }
0x15c7   :  { %v1574_v43 = vpack.c.bf16 %v1573_v38, %v1573_v38 }
0x15c8   :  { %1577 = vrot.lane.b32.xlu0 %v1575_v44, %s2399_s20 }
0x15c9   :  { %1623 = vrot.lane.b32.xlu1 %v1574_v43, %s2399_s20 }
0x163a   :  { %v1578_v45 = vpop.permute.xlu0 %1577 }
0x163b   :  { %v1624_v42 = vpop.permute.xlu1 %1623  ;;  %2182 = vmatmul.mubr.msk.bf16.vlgmr.msra.gmra.mrb[48].mxu0 %vm200_vm3, %v1578_v45 }
0x163c   :  { %2190 = vmatmul.mubr.msk.bf16.vlgmr.msra.gmra.mrb[48].mxu1 %vm200_vm3, %v1624_v42  ;;  %2197 = vmatprep.mubr.msk.bf16.mxu0 %vm2396_vm0, %v2395_v0 }
0x163d   :  { %2205 = vmatprep.mubr.msk.bf16.mxu1 %vm2396_vm0, %v2395_v0  ;;  %2194 = vmatpush3.bf16.msra.mxu0 %v2226_v2 }
0x163e   :  { %2195 = vmatprep.subr.bf16.mxu0 %v2395_v0  ;;  %2202 = vmatpush3.bf16.msra.mxu1 %v2228_v7 }
0x163f   :  { %2203 = vmatprep.subr.bf16.mxu1 %v2395_v0 }
0x1641   :  { %2196 = vmatpush3.bf16.msra.mxu0 %v2227_v4 }
0x1642   :  { %2204 = vmatpush3.bf16.msra.mxu1 %v2229_v33 }
0x170e   :  { %v1616_v46 = vpop.f32.mrb[48].mxu0 }
0x170f   :  { %v1662_v47 = vpop.f32.mrb[48].mxu1  ;;  %v2183_v48 = vpop.f32.mrb[49].mxu0 }
0x1710   :  { %v1663_v50 = vadd.f32 %v1662_v47, %v1616_v46  ;;  %v2191_v51 = vpop.f32.mrb[49].mxu1  ;;  %v1619_v52 = vpop.f32.mrb[50].mxu0 }
0x1711   :  { %v1665_v53 = vpop.f32.mrb[50].mxu1  ;;  %v2184_v54 = vpop.f32.mrb[51].mxu0 }
0x1712   :  { %v1668_v40 = vadd.f32 %v2369_v55, %v1663_v50  ;;  %v2192_v12 = vpop.f32.mrb[51].mxu1 }
0x1714   :  { %2350 = vtanh.f32 %v1668_v40  ;;  %v1899_v57 = vmul.f32 -1.442695, %v1668_v40 }
0x1716   :  { %2352 = vpow2.f32 %v1899_v57 }
0x171e   :  { %v2351_v56 = vpop.eup %2350 }
0x171f   :  { %1678 = vrot.lane.b32.xlu0 %v2351_v56, %s2398_s19 }
0x1720   :  { %v2353_v58 = vpop.eup %2352 }
0x1721   :  { %v1672_v59 = vadd.f32 1.0, %v2353_v58 }
0x1723   :  { %2354 = vrcp.f32 %v1672_v59 }
0x172d   :  { %v2355_v60 = vpop.eup %2354 }
0x172e   :  { %v1676_v63 = vmul.f32 %v2355_v60, %v1502_v39 }
0x1791   :  { %v1679_v61 = vpop.permute.xlu0 %1678 }
0x1792   :  { %v1681_v62 = vmul.f32 %v2355_v60, %v1679_v61 }
0x1794   :  { %1683 = vrot.lane.b32.xlu1 %v1681_v62, %s2399_s20 }
0x1806   :  { %v1684_v1 = vpop.permute.xlu1 %1683 }
0x1807   :  { %v1686_v9 = vadd.f32 %v1684_v1, %v1676_v63 }
0x1809   :  { %2356 = vtanh.f32 %v1686_v9 }
0x1813   :  { %v2357_v5 = vpop.eup %2356 }
0x1814   :  { %1689 = vrot.lane.b32.xlu0 %v2357_v5, %s2398_s19 }
0x1886   :  { %v1690_v3 = vpop.permute.xlu0 %1689 }
0x1887   :  { %v1692_v6 = vmul.f32 %v2355_v60, %v1690_v3 }
0x1889   :  { %v1693_v29 = vpack.c.bf16 %v1692_v6, %v1692_v6 }
0x188b   :  { %1706 = vrot.lane.b32.xlu1 %v1693_v29, %s2399_s20 }
0x18fd   :  { %v1707_v10 = vpop.permute.xlu1 %1706 }
0x18fe   :  { %2198 = vmatmul.mubr.msk.bf16.vlgmr.msra.gmra.mrb[52].mxu0 %vm200_vm3, %v1707_v10 }
0x19d1   :  { %v1757_v14 = vpop.f32.mrb[52].mxu0 }
0x19d2   :  { %v1758_v16 = vadd.f32 %v1900_v11, %v1757_v14  ;;  %v2199_v0 = vpop.f32.mrb[53].mxu0 }
0x19d3   :  { %v1760_v17 = vpop.f32.mrb[54].mxu0 }
0x19d4   :  { %v1763_v30 = vmax.f32 %v1758_v16, 0.0  ;;  %v2200_v13 = vpop.f32.mrb[55].mxu0 }
0x19d6   :  { %v1764_v15 = vpack.c.bf16 %v1763_v30, %v1763_v30 }
0x19d8   :  { %2206 = vmatmul.mubr.msk.bf16.vlgmr.msra.gmra.mrb[52].mxu1 %vm200_vm3, %v1764_v15 }
0x1aab   :  { %v1825_v49 = vpop.f32.mrb[52].mxu1 }
0x1aac   :  { %v1826_v20 = vadd.f32 %v1904_v41, %v1825_v49  ;;  %v2207_v34 = vpop.f32.mrb[53].mxu1 }
0x1aad   :  { %v1828_v18 = vpop.f32.mrb[54].mxu1 }
0x1aae   :  { %2358 = vtanh.f32 %v1826_v20  ;;  %v2208_v21 = vpop.f32.mrb[55].mxu1 }
0x1ab8   :  { %v2359_v23 = vpop.eup %2358 }
0x1ab9   :  { %v1832_v22 = vand.u32 2147483647, %v2359_v23 }
0x1abb   :  { %v1834_v24 = vsel %vm1833_vm4, %v1832_v22, 0.0 }
0x1abc   :  { %1835 = vadd.xlane.f32.xlu0 %v1834_v24 }
0x1b49   :  { %v1836_v25 = vpop.xlane.xlu0 %1835 }
0x1b4a   :  { %v1837_v26 = vmax.f32 %v1836_v25, 1.0 }
0x1b4c   :  { %2360 = vrcp.f32 %v1837_v26 }
0x1b56   :  { %v2361_v27 = vpop.eup %2360 }
0x1b57   :  { %v1839_v19 = vmul.f32 %v2361_v27, %v2359_v23 }
0x1b59   :  { %1840 = vst.msk [vmem:[%s2905_s11] sm:$0xff] %vm1833_vm4, %v1839_v19 }
0x1b5a   :  { %1845 = vsyncpa [#allocation3], 1 }

</bundles_post_ra>
